<compile_context>
chip_gen: v6e
topology: v6e:2x2x1
jax: 0.10.0
libtpu: 0.0.40
codegen_flags: <defaults>
</compile_context>

<pallas_src>
import functools

import jax
import jax.numpy as jnp
from jax import lax
from jax.experimental import pallas as pl
from jax.experimental.pallas import tpu as pltpu


_NEG_INF = -1e30  # large finite "minus infinity" (avoids inf-inf -> NaN)


def _round_up(n, m):
    return ((n + m - 1) // m) * m


def _largest_divisor_leq(n, cap, multiple_of=1):
    """Largest divisor of n that is <= cap and a multiple of `multiple_of`."""
    if n <= cap and n % multiple_of == 0:
        return n
    for d in range(min(cap, n), 0, -1):
        if n % d == 0 and d % multiple_of == 0:
            return d
    return n


def _vmem_bytes_estimate(hb, tq, tkv, D, Dv, nkv, q_bytes, v_bytes,
                         out_bytes, attn_bytes, with_cache):
    """Rough upper bound on the kernel VMEM footprint (double-buffered IO,
    scratch, the probability cache and ~2 logits-sized f32 temporaries)."""
    def p8(n):
        return _round_up(n, 8)

    def p128(n):
        return _round_up(n, 128)

    total = (
        2 * hb * p8(tq) * p128(D) * q_bytes            # q  (double-buffered)
        + 2 * hb * p8(tkv) * p128(D) * q_bytes         # k
        + 2 * hb * p8(tkv) * p128(Dv) * v_bytes        # v
        + 2 * hb * p8(tq) * p128(Dv) * out_bytes       # updates out
        + 2 * hb * p8(tq) * p128(tkv) * attn_bytes     # attn out
        + 2 * hb * p8(tq) * 128 * 4                    # m, l scratch
        + hb * p8(tq) * p128(Dv) * 4                   # f32 PV accumulator
        + 2 * hb * p8(tq) * p128(tkv) * 4)             # logits / exp temporaries
    if with_cache:
        total += nkv * hb * p8(tq) * (p128(tkv) + 128) * 4
    return total


def _attention_kernel(q_ref, k_ref, v_ref, out_ref, attn_ref,
                      m_ref, l_ref, acc_ref, *cache_refs,
                      scale, kv_len, tkv, cache_probs, bf16_matmul):
    # Grid axes: (batch, head-block, q-tile, pass, kv-tile)
    p = pl.program_id(3)
    kt = pl.program_id(4)
    nkv = pl.num_programs(4)
    mask_kv = (kv_len % tkv) != 0          # static: last kv tile is padded

    @pl.when(jnp.logical_and(p == 0, kt == 0))
    def _init():
        m_ref[...] = jnp.full_like(m_ref, _NEG_INF)
        l_ref[...] = jnp.zeros_like(l_ref)
        acc_ref[...] = jnp.zeros_like(acc_ref)

    def qk_logits():
        # f32 inputs are scaled in f32 then cast to bf16 for the MXU (f32 acc);
        # bf16 inputs feed the MXU directly.
        q = q_ref[0] * scale                       # [hb, tq, D]
        k = k_ref[0]                               # [hb, tkv, D]
        if bf16_matmul and q_ref.dtype == jnp.float32:
            q = q.astype(jnp.bfloat16)
            k = k.astype(jnp.bfloat16)
        s = lax.dot_general(q, k,
                            dimension_numbers=(((2,), (2,)), ((0,), (0,))),
                            preferred_element_type=jnp.float32)
        if mask_kv:
            col = lax.broadcasted_iota(jnp.int32, s.shape, 2) + kt * tkv
            s = jnp.where(col < kv_len, s, _NEG_INF)
        return s                                   # [hb, tq, tkv] f32

    @pl.when(p == 0)
    def _stats_and_pv():
        s = qk_logits()
        v = v_ref[0]                               # [hb, tkv, Dv]
        pv_dtype = (jnp.bfloat16 if (bf16_matmul and v.dtype == jnp.float32)
                    else v.dtype)
        m_prev = m_ref[...]
        m_new = jnp.maximum(m_prev, jnp.max(s, axis=-1, keepdims=True))
        alpha = jnp.exp(m_prev - m_new)
        e = jnp.exp(s - m_new)
        l_ref[...] = alpha * l_ref[...] + jnp.sum(e, axis=-1, keepdims=True)
        acc_ref[...] = alpha * acc_ref[...] + lax.dot_general(
            e.astype(pv_dtype), v.astype(pv_dtype),
            dimension_numbers=(((2,), (1,)), ((0,), (0,))),
            preferred_element_type=jnp.float32)
        m_ref[...] = m_new
        if cache_probs:
            e_cache_ref, mt_cache_ref = cache_refs
            e_cache_ref[kt] = e                    # exp(s - m_tile), f32
            mt_cache_ref[kt] = m_new               # running max at this tile

    @pl.when(p == 1)
    def _write_attn():
        # Exact (non-approximate) normalizer: the module returns the exact
        # softmax as its second output.
        inv_l = 1.0 / l_ref[...]
        if cache_probs:
            e_cache_ref, mt_cache_ref = cache_refs
            corr = jnp.exp(mt_cache_ref[kt] - m_ref[...]) * inv_l
            attn_ref[0] = (e_cache_ref[kt] * corr).astype(attn_ref.dtype)
        else:
            s = qk_logits()
            attn_ref[0] = (jnp.exp(s - m_ref[...]) * inv_l).astype(attn_ref.dtype)

    @pl.when(jnp.logical_and(p == 1, kt == nkv - 1))
    def _finalize():
        inv_l = pl.reciprocal(l_ref[...], approx=True)
        out_ref[0] = (acc_ref[...] * inv_l).astype(out_ref.dtype)


def generalized_dot_product_attention(
        query, key, value, *,
        max_q_tile=512,                 # review: tq=512 halves K/V re-streaming
        max_kv_tile=512,
        max_head_block=8,
        attn_dtype=jnp.float32,         # pass bf16 to halve the attn writeback
        bf16_matmul=True,               # f32 inputs hit the MXU as bf16 (f32 acc)
        cache_probs="auto",             # cache pass-0 prob tiles in VMEM
        cache_budget_bytes=10 * 1024 * 1024,
        vmem_limit_bytes=48 * 1024 * 1024,   # legal on v7x (64 MiB VMEM)
):
    """query: [B, qn, H, D], key: [B, kn, H, D], value: [B, kn, H, Dv].

    Returns (updates [B, qn, H, Dv], attn [B, H, qn, kn]).
    On 128 MiB-VMEM parts (v5e) pass max_q_tile=1024, vmem_limit_bytes~96 MiB.
    """
    B, qn, H, D = query.shape
    kn = key.shape[1]
    Dv = value.shape[-1]
    scale = 1.0 / (D ** 0.5)

    # Pad q_num to a sublane multiple (8) and kv_num to a lane multiple (128):
    # tiles stay (8, 128)-aligned; padded keys are masked to -inf in-kernel and
    # padded rows/cols are sliced off below.
    qn_pad = _round_up(qn, 8)
    kn_pad = _round_up(kn, 128)
    if qn_pad != qn:
        query = jnp.pad(query, ((0, 0), (0, qn_pad - qn), (0, 0), (0, 0)))
    if kn_pad != kn:
        key = jnp.pad(key, ((0, 0), (0, kn_pad - kn), (0, 0), (0, 0)))
        value = jnp.pad(value, ((0, 0), (0, kn_pad - kn), (0, 0), (0, 0)))

    tq = _largest_divisor_leq(qn_pad, max_q_tile, multiple_of=8)
    tkv = _largest_divisor_leq(kn_pad, max_kv_tile, multiple_of=128)
    hb = _largest_divisor_leq(H, max_head_block)

    # v7x has two TensorCores sharded over the 'parallel' grid axes: make sure
    # their combined extent is >= 2 whenever the shape allows it.
    if B * (H // hb) * (qn_pad // tq) < 2:
        if hb > 1:
            hb = _largest_divisor_leq(H, hb // 2)
        elif tq > 8 and tq % 16 == 0:
            tq //= 2
    nkv = kn_pad // tkv

    q_bytes = query.dtype.itemsize
    v_bytes = value.dtype.itemsize
    attn_bytes = jnp.dtype(attn_dtype).itemsize

    # Probability-cache gate: f32 cache keeps the attention exact; only enable
    # it when both the cache and the total estimated footprint fit.
    cache_bytes = nkv * hb * tq * (_round_up(tkv, 128) + 128) * 4
    if cache_probs == "auto":
        use_cache = (
            cache_bytes <= cache_budget_bytes
            and _vmem_bytes_estimate(hb, tq, tkv, D, Dv, nkv, q_bytes, v_bytes,
                                     v_bytes, attn_bytes, with_cache=True)
            <= int(0.92 * vmem_limit_bytes))
    else:
        use_cache = bool(cache_probs)

    # Head-major layout for the kernel; allow_input_fusion asks XLA to fold
    # these transposes into the pallas_call input fetches (Q/K/V bytes are a
    # small fraction of the mandatory attn writeback either way).
    qh = jnp.transpose(query, (0, 2, 1, 3))   # [B, H, qn_pad, D]
    kh = jnp.transpose(key, (0, 2, 1, 3))     # [B, H, kn_pad, D]
    vh = jnp.transpose(value, (0, 2, 1, 3))   # [B, H, kn_pad, Dv]

    grid = (B, H // hb, qn_pad // tq, 2, nkv)
    last_kv = nkv - 1

    # V is only consumed in pass 0: park it on the *last-fetched* block during
    # pass 1 so the pass transition issues no extra DMA.  K is parked too when
    # the probability cache removes the pass-1 logit recompute.
    v_index = lambda b, h, qi, p, kt: (b, h, kt * (1 - p) + last_kv * p, 0)
    k_index = v_index if use_cache else (lambda b, h, qi, p, kt: (b, h, kt, 0))

    kernel = functools.partial(
        _attention_kernel, scale=scale, kv_len=kn, tkv=tkv,
        cache_probs=use_cache, bf16_matmul=bf16_matmul)

    scratch_shapes = [
        pltpu.VMEM((hb, tq, 1), jnp.float32),    # running row max
        pltpu.VMEM((hb, tq, 1), jnp.float32),    # running row sum
        pltpu.VMEM((hb, tq, Dv), jnp.float32),   # f32 PV accumulator
    ]
    if use_cache:
        scratch_shapes += [
            pltpu.VMEM((nkv, hb, tq, tkv), jnp.float32),  # exp(s - m_tile) tiles
            pltpu.VMEM((nkv, hb, tq, 1), jnp.float32),    # per-tile running max
        ]

    updates_hm, attn = pl.pallas_call(
        kernel,
        out_shape=(
            jax.ShapeDtypeStruct((B, H, qn_pad, Dv), value.dtype),
            jax.ShapeDtypeStruct((B, H, qn_pad, kn_pad), attn_dtype),
        ),
        grid=grid,
        in_specs=[
            # q: resident across the (pass, kv) reduction axes.
            pl.BlockSpec((1, hb, tq, D), lambda b, h, qi, p, kt: (b, h, qi, 0)),
            pl.BlockSpec((1, hb, tkv, D), k_index),
            pl.BlockSpec((1, hb, tkv, Dv), v_index),
        ],
        out_specs=(
            # updates: accumulator-style resident block, written at finalize.
            pl.BlockSpec((1, hb, tq, Dv), lambda b, h, qi, p, kt: (b, h, qi, 0)),
            # attn: parked on block 0 during pass 0 (never flushed before pass
            # 1 overwrites it), then one tile per kv block in pass 1.
            pl.BlockSpec((1, hb, tq, tkv),
                         lambda b, h, qi, p, kt: (b, h, qi, kt * p)),
        ),
        scratch_shapes=scratch_shapes,
        compiler_params=pltpu.CompilerParams(
            dimension_semantics=("parallel", "parallel", "parallel",
                                 "arbitrary", "arbitrary"),
            vmem_limit_bytes=vmem_limit_bytes,
            allow_input_fusion=[True, True, True],
        ),
    )(qh, kh, vh)

    # Back to the 'bqhd' einsum output layout and strip the padding.
    updates = jnp.transpose(updates_hm, (0, 2, 1, 3))
    if qn_pad != qn:
        updates = updates[:, :qn]
    if qn_pad != qn or kn_pad != kn:
        attn = attn[:, :, :qn, :kn]
    return updates, attn


def _reference(query, key, value):
    D = query.shape[-1]
    q = query / (D ** 0.5)
    attn = jnp.einsum('bqhd,bkhd->bhqk', q, key,
                      precision=lax.Precision.HIGHEST)
    attn = jax.nn.softmax(attn, axis=-1)
    updates = jnp.einsum('bhqk,bkhd->bqhd', attn, value,
                         precision=lax.Precision.HIGHEST)
    return updates, attn


if __name__ == "__main__":
    def run_case(B, qn, kn, H, D, Dv, seed, **kw):
        kq, kk, kv = jax.random.split(jax.random.PRNGKey(seed), 3)
        query = jax.random.normal(kq, (B, qn, H, D), dtype=jnp.float32)
        key_ = jax.random.normal(kk, (B, kn, H, D), dtype=jnp.float32)
        value = jax.random.normal(kv, (B, kn, H, Dv), dtype=jnp.float32)

        updates, attn = generalized_dot_product_attention(query, key_, value, **kw)
        jax.block_until_ready((updates, attn))

        ref_updates, ref_attn = _reference(query, key_, value)
        assert updates.shape == (B, qn, H, Dv)
        assert attn.shape == (B, H, qn, kn)
        # Returned attention rows must sum to ~1 (exact normalizer).
        row_sum = jnp.sum(attn, axis=-1)
        assert jnp.allclose(row_sum, jnp.ones_like(row_sum), atol=1e-3), \
            float(jnp.max(jnp.abs(row_sum - 1.0)))
        # Tolerance covers bf16 MXU operands (f32 accumulation throughout).
        assert jnp.allclose(updates, ref_updates, atol=2e-2, rtol=2e-2), \
            float(jnp.max(jnp.abs(updates - ref_updates)))
        assert jnp.allclose(attn, ref_attn, atol=2e-2, rtol=2e-2), \
            float(jnp.max(jnp.abs(attn - ref_attn)))

    # Small slot-attention-like shape (exercises kv padding/masking, nkv == 1).
    run_case(B=2, qn=8, kn=8, H=4, D=32, Dv=32, seed=0)
    # Tiled path with the VMEM probability cache + TensorCore-parallelism guard.
    run_case(B=1, qn=512, kn=1024, H=4, D=64, Dv=64, seed=1)
    # Regression for the parked attn output block: multiple q AND kv tiles on
    # the recompute (non-cached) path.
    run_case(B=1, qn=1024, kn=1536, H=2, D=64, Dv=64, seed=2, cache_probs=False)
    # Unaligned q_num / kv_num exercising both pads + output slicing.
    run_case(B=1, qn=100, kn=200, H=2, D=32, Dv=48, seed=3)

    print("KERNEL_OK")
</pallas_src>

<mosaic_0001>
module attributes {stable_mosaic.version = 11 : i64} {
  func.func @_attention_kernel(%arg0: i32, %arg1: i32, %arg2: i32, %arg3: i32, %arg4: i32, %arg5: memref<1x4x8x32xf32, #tpu.memory_space<vmem>>, %arg6: memref<1x4x128x32xf32, #tpu.memory_space<vmem>>, %arg7: memref<1x4x128x32xf32, #tpu.memory_space<vmem>>, %arg8: memref<1x4x8x32xf32, #tpu.memory_space<vmem>>, %arg9: memref<1x4x8x128xf32, #tpu.memory_space<vmem>>, %arg10: memref<4x8x1xf32, #tpu.memory_space<vmem>>, %arg11: memref<4x8x1xf32, #tpu.memory_space<vmem>>, %arg12: memref<4x8x32xf32, #tpu.memory_space<vmem>>, %arg13: memref<1x4x8x128xf32, #tpu.memory_space<vmem>>, %arg14: memref<1x4x8x1xf32, #tpu.memory_space<vmem>>) attributes {dimension_semantics = [#tpu.dimension_semantics<parallel>, #tpu.dimension_semantics<parallel>, #tpu.dimension_semantics<parallel>, #tpu.dimension_semantics<arbitrary>, #tpu.dimension_semantics<arbitrary>], iteration_bounds = array<i64: 2, 1, 1, 2, 1>, scalar_prefetch = 0 : i64, scratch_operands = 5 : i64, tpu.core_type = #tpu.core_type<tc>, window_params = [{transform_indices = @transform_0, window_bounds = array<i64: 1, 4, 8, 32>}, {transform_indices = @transform_1, window_bounds = array<i64: 1, 4, 128, 32>}, {transform_indices = @transform_2, window_bounds = array<i64: 1, 4, 128, 32>}, {transform_indices = @transform_3, window_bounds = array<i64: 1, 4, 8, 32>}, {transform_indices = @transform_4, window_bounds = array<i64: 1, 4, 8, 128>}]} {
    %c0_i32 = arith.constant 0 : i32
    %0 = arith.cmpi eq, %arg3, %c0_i32 : i32
    %c0_i32_0 = arith.constant 0 : i32
    %1 = arith.cmpi eq, %arg4, %c0_i32_0 : i32
    %2 = arith.andi %0, %1 : i1
    %3 = arith.extui %2 : i1 to i32
    %c0_i32_1 = arith.constant 0 : i32
    %4 = arith.cmpi ne, %3, %c0_i32_1 : i32
    scf.if %4 {
      %cst = arith.constant -1.000000e+30 : f32
      %16 = vector.broadcast %cst : f32 to vector<4x8x1xf32>
      %c0 = arith.constant 0 : index
      %c0_8 = arith.constant 0 : index
      %c0_9 = arith.constant 0 : index
      %17 = vector.load %arg10[%c0, %c0_8, %c0_9] : memref<4x8x1xf32, #tpu.memory_space<vmem>>, vector<4x8x1xf32>
      tpu.vector_store %arg10[%c0, %c0_8, %c0_9], %16 {strides = array<i32>} : memref<4x8x1xf32, #tpu.memory_space<vmem>>, vector<4x8x1xf32>,
      %cst_10 = arith.constant 0.000000e+00 : f32
      %18 = vector.broadcast %cst_10 : f32 to vector<4x8x1xf32>
      %c0_11 = arith.constant 0 : index
      %c0_12 = arith.constant 0 : index
      %c0_13 = arith.constant 0 : index
      %19 = vector.load %arg11[%c0_11, %c0_12, %c0_13] : memref<4x8x1xf32, #tpu.memory_space<vmem>>, vector<4x8x1xf32>
      tpu.vector_store %arg11[%c0_11, %c0_12, %c0_13], %18 {strides = array<i32>} : memref<4x8x1xf32, #tpu.memory_space<vmem>>, vector<4x8x1xf32>,
      %cst_14 = arith.constant 0.000000e+00 : f32
      %20 = vector.broadcast %cst_14 : f32 to vector<4x8x32xf32>
      %c0_15 = arith.constant 0 : index
      %c0_16 = arith.constant 0 : index
      %c0_17 = arith.constant 0 : index
      %21 = vector.load %arg12[%c0_15, %c0_16, %c0_17] : memref<4x8x32xf32, #tpu.memory_space<vmem>>, vector<4x8x32xf32>
      tpu.vector_store %arg12[%c0_15, %c0_16, %c0_17], %20 {strides = array<i32>} : memref<4x8x32xf32, #tpu.memory_space<vmem>>, vector<4x8x32xf32>,
    } else {
    }
    %c0_i32_2 = arith.constant 0 : i32
    %5 = arith.cmpi eq, %arg3, %c0_i32_2 : i32
    %6 = arith.extui %5 : i1 to i32
    %c0_i32_3 = arith.constant 0 : i32
    %7 = arith.cmpi ne, %6, %c0_i32_3 : i32
    scf.if %7 {
      %c0 = arith.constant 0 : index
      %c0_8 = arith.constant 0 : index
      %c0_9 = arith.constant 0 : index
      %c0_10 = arith.constant 0 : index
      %16 = vector.load %arg5[%c0, %c0_8, %c0_9, %c0_10] : memref<1x4x8x32xf32, #tpu.memory_space<vmem>>, vector<1x4x8x32xf32>
      %17 = vector.shape_cast %16 : vector<1x4x8x32xf32> to vector<4x8x32xf32>
      %cst = arith.constant 0.176776692 : f32
      %18 = vector.broadcast %cst : f32 to vector<4x8x32xf32>
      %19 = arith.mulf %17, %18 : vector<4x8x32xf32>
      %c0_11 = arith.constant 0 : index
      %c0_12 = arith.constant 0 : index
      %c0_13 = arith.constant 0 : index
      %c0_14 = arith.constant 0 : index
      %20 = vector.load %arg6[%c0_11, %c0_12, %c0_13, %c0_14] : memref<1x4x128x32xf32, #tpu.memory_space<vmem>>, vector<1x4x128x32xf32>
      %21 = vector.shape_cast %20 : vector<1x4x128x32xf32> to vector<4x128x32xf32>
      %22 = arith.truncf %19 : vector<4x8x32xf32> to vector<4x8x32xbf16>
      %23 = arith.truncf %21 : vector<4x128x32xf32> to vector<4x128x32xbf16>
      %cst_15 = arith.constant dense<0.000000e+00> : vector<4x8x128xf32>
      %24 = tpu.matmul %22, %23, %cst_15 {dimension_numbers = #tpu.dot_dimension_numbers<[2], [2], [1], [1], [0, 0, 0, 1, 1, 1], [0], [0]>} : vector<4x8x32xbf16>, vector<4x128x32xbf16>, vector<4x8x128xf32> -> vector<4x8x128xf32>
      %25 = tpu.iota {dimensions = array<i32: 2>} : vector<4x8x128xi32>
      %c128_i32 = arith.constant 128 : i32
      %26 = arith.muli %arg4, %c128_i32 : i32
      %27 = vector.broadcast %26 : i32 to vector<4x8x128xi32>
      %28 = arith.addi %25, %27 : vector<4x8x128xi32>
      %c8_i32 = arith.constant 8 : i32
      %29 = vector.broadcast %c8_i32 : i32 to vector<4x8x128xi32>
      %30 = arith.cmpi slt, %28, %29 : vector<4x8x128xi32>
      %cst_16 = arith.constant -1.000000e+30 : f32
      %31 = vector.broadcast %cst_16 : f32 to vector<4x8x128xf32>
      %32 = arith.select %30, %24, %31 : vector<4x8x128xi1>, vector<4x8x128xf32>
      %c0_17 = arith.constant 0 : index
      %c0_18 = arith.constant 0 : index
      %c0_19 = arith.constant 0 : index
      %c0_20 = arith.constant 0 : index
      %33 = vector.load %arg7[%c0_17, %c0_18, %c0_19, %c0_20] : memref<1x4x128x32xf32, #tpu.memory_space<vmem>>, vector<1x4x128x32xf32>
      %34 = vector.shape_cast %33 : vector<1x4x128x32xf32> to vector<4x128x32xf32>
      %c0_21 = arith.constant 0 : index
      %c0_22 = arith.constant 0 : index
      %c0_23 = arith.constant 0 : index
      %35 = vector.load %arg10[%c0_21, %c0_22, %c0_23] : memref<4x8x1xf32, #tpu.memory_space<vmem>>, vector<4x8x1xf32>
      %cst_24 = arith.constant dense<0xFF800000> : vector<4x8xf32>
      %36 = vector.multi_reduction <maximumf>, %32, %cst_24 [2] : vector<4x8x128xf32> to vector<4x8xf32>
      %37 = vector.shape_cast %36 : vector<4x8xf32> to vector<4x8x1xf32>
      %38 = arith.maximumf %35, %37 : vector<4x8x1xf32>
      %39 = arith.subf %35, %38 : vector<4x8x1xf32>
      %40 = math.exp %39 : vector<4x8x1xf32>
      %41 = vector.broadcast %38 : vector<4x8x1xf32> to vector<4x8x128xf32>
      %42 = arith.subf %32, %41 : vector<4x8x128xf32>
      %43 = math.exp %42 : vector<4x8x128xf32>
      %c0_25 = arith.constant 0 : index
      %c0_26 = arith.constant 0 : index
      %c0_27 = arith.constant 0 : index
      %44 = vector.load %arg11[%c0_25, %c0_26, %c0_27] : memref<4x8x1xf32, #tpu.memory_space<vmem>>, vector<4x8x1xf32>
      %45 = arith.mulf %40, %44 : vector<4x8x1xf32>
      %cst_28 = arith.constant dense<0.000000e+00> : vector<4x8xf32>
      %46 = vector.multi_reduction <add>, %43, %cst_28 [2] : vector<4x8x128xf32> to vector<4x8xf32>
      %47 = vector.shape_cast %46 : vector<4x8xf32> to vector<4x8x1xf32>
      %48 = arith.addf %45, %47 : vector<4x8x1xf32>
      %c0_29 = arith.constant 0 : index
      %c0_30 = arith.constant 0 : index
      %c0_31 = arith.constant 0 : index
      %49 = vector.load %arg11[%c0_29, %c0_30, %c0_31] : memref<4x8x1xf32, #tpu.memory_space<vmem>>, vector<4x8x1xf32>
      tpu.vector_store %arg11[%c0_29, %c0_30, %c0_31], %48 {strides = array<i32>} : memref<4x8x1xf32, #tpu.memory_space<vmem>>, vector<4x8x1xf32>,
      %c0_32 = arith.constant 0 : index
      %c0_33 = arith.constant 0 : index
      %c0_34 = arith.constant 0 : index
      %50 = vector.load %arg12[%c0_32, %c0_33, %c0_34] : memref<4x8x32xf32, #tpu.memory_space<vmem>>, vector<4x8x32xf32>
      %51 = vector.broadcast %40 : vector<4x8x1xf32> to vector<4x8x32xf32>
      %52 = arith.mulf %51, %50 : vector<4x8x32xf32>
      %53 = arith.truncf %43 : vector<4x8x128xf32> to vector<4x8x128xbf16>
      %54 = arith.truncf %34 : vector<4x128x32xf32> to vector<4x128x32xbf16>
      %cst_35 = arith.constant dense<0.000000e+00> : vector<4x8x32xf32>
      %55 = tpu.matmul %53, %54, %cst_35 {dimension_numbers = #tpu.dot_dimension_numbers<[2], [1], [1], [2], [0, 0, 0, 1, 1, 2], [0], [0]>} : vector<4x8x128xbf16>, vector<4x128x32xbf16>, vector<4x8x32xf32> -> vector<4x8x32xf32>
      %56 = arith.addf %52, %55 : vector<4x8x32xf32>
      %c0_36 = arith.constant 0 : index
      %c0_37 = arith.constant 0 : index
      %c0_38 = arith.constant 0 : index
      %57 = vector.load %arg12[%c0_36, %c0_37, %c0_38] : memref<4x8x32xf32, #tpu.memory_space<vmem>>, vector<4x8x32xf32>
      tpu.vector_store %arg12[%c0_36, %c0_37, %c0_38], %56 {strides = array<i32>} : memref<4x8x32xf32, #tpu.memory_space<vmem>>, vector<4x8x32xf32>,
      %c0_39 = arith.constant 0 : index
      %c0_40 = arith.constant 0 : index
      %c0_41 = arith.constant 0 : index
      %58 = vector.load %arg10[%c0_39, %c0_40, %c0_41] : memref<4x8x1xf32, #tpu.memory_space<vmem>>, vector<4x8x1xf32>
      tpu.vector_store %arg10[%c0_39, %c0_40, %c0_41], %38 {strides = array<i32>} : memref<4x8x1xf32, #tpu.memory_space<vmem>>, vector<4x8x1xf32>,
      %59 = arith.index_cast %arg4 : i32 to index
      %c0_42 = arith.constant 0 : index
      %c0_43 = arith.constant 0 : index
      %c0_44 = arith.constant 0 : index
      %60 = vector.load %arg13[%59, %c0_42, %c0_43, %c0_44] : memref<1x4x8x128xf32, #tpu.memory_space<vmem>>, vector<1x4x8x128xf32>
      %61 = vector.shape_cast %60 : vector<1x4x8x128xf32> to vector<4x8x128xf32>
      %62 = vector.shape_cast %43 : vector<4x8x128xf32> to vector<1x4x8x128xf32>
      tpu.vector_store %arg13[%59, %c0_42, %c0_43, %c0_44], %62 {strides = array<i32>} : memref<1x4x8x128xf32, #tpu.memory_space<vmem>>, vector<1x4x8x128xf32>,
      %63 = arith.index_cast %arg4 : i32 to index
      %c0_45 = arith.constant 0 : index
      %c0_46 = arith.constant 0 : index
      %c0_47 = arith.constant 0 : index
      %64 = vector.load %arg14[%63, %c0_45, %c0_46, %c0_47] : memref<1x4x8x1xf32, #tpu.memory_space<vmem>>, vector<1x4x8x1xf32>
      %65 = vector.shape_cast %64 : vector<1x4x8x1xf32> to vector<4x8x1xf32>
      %66 = vector.shape_cast %38 : vector<4x8x1xf32> to vector<1x4x8x1xf32>
      tpu.vector_store %arg14[%63, %c0_45, %c0_46, %c0_47], %66 {strides = array<i32>} : memref<1x4x8x1xf32, #tpu.memory_space<vmem>>, vector<1x4x8x1xf32>,
    } else {
    }
    %c1_i32 = arith.constant 1 : i32
    %8 = arith.cmpi eq, %arg3, %c1_i32 : i32
    %9 = arith.extui %8 : i1 to i32
    %c0_i32_4 = arith.constant 0 : i32
    %10 = arith.cmpi ne, %9, %c0_i32_4 : i32
    scf.if %10 {
      %c0 = arith.constant 0 : index
      %c0_8 = arith.constant 0 : index
      %c0_9 = arith.constant 0 : index
      %16 = vector.load %arg11[%c0, %c0_8, %c0_9] : memref<4x8x1xf32, #tpu.memory_space<vmem>>, vector<4x8x1xf32>
      %cst = arith.constant 1.000000e+00 : f32
      %17 = vector.broadcast %cst : f32 to vector<4x8x1xf32>
      %18 = arith.divf %17, %16 : vector<4x8x1xf32>
      %19 = arith.index_cast %arg4 : i32 to index
      %c0_10 = arith.constant 0 : index
      %c0_11 = arith.constant 0 : index
      %c0_12 = arith.constant 0 : index
      %20 = vector.load %arg14[%19, %c0_10, %c0_11, %c0_12] : memref<1x4x8x1xf32, #tpu.memory_space<vmem>>, vector<1x4x8x1xf32>
      %21 = vector.shape_cast %20 : vector<1x4x8x1xf32> to vector<4x8x1xf32>
      %c0_13 = arith.constant 0 : index
      %c0_14 = arith.constant 0 : index
      %c0_15 = arith.constant 0 : index
      %22 = vector.load %arg10[%c0_13, %c0_14, %c0_15] : memref<4x8x1xf32, #tpu.memory_space<vmem>>, vector<4x8x1xf32>
      %23 = arith.subf %21, %22 : vector<4x8x1xf32>
      %24 = math.exp %23 : vector<4x8x1xf32>
      %25 = arith.mulf %24, %18 : vector<4x8x1xf32>
      %26 = arith.index_cast %arg4 : i32 to index
      %c0_16 = arith.constant 0 : index
      %c0_17 = arith.constant 0 : index
      %c0_18 = arith.constant 0 : index
      %27 = vector.load %arg13[%26, %c0_16, %c0_17, %c0_18] : memref<1x4x8x128xf32, #tpu.memory_space<vmem>>, vector<1x4x8x128xf32>
      %28 = vector.shape_cast %27 : vector<1x4x8x128xf32> to vector<4x8x128xf32>
      %29 = vector.broadcast %25 : vector<4x8x1xf32> to vector<4x8x128xf32>
      %30 = arith.mulf %28, %29 : vector<4x8x128xf32>
      %c0_19 = arith.constant 0 : index
      %c0_20 = arith.constant 0 : index
      %c0_21 = arith.constant 0 : index
      %c0_22 = arith.constant 0 : index
      %31 = vector.load %arg9[%c0_19, %c0_20, %c0_21, %c0_22] : memref<1x4x8x128xf32, #tpu.memory_space<vmem>>, vector<1x4x8x128xf32>
      %32 = vector.shape_cast %31 : vector<1x4x8x128xf32> to vector<4x8x128xf32>
      %33 = vector.shape_cast %30 : vector<4x8x128xf32> to vector<1x4x8x128xf32>
      tpu.vector_store %arg9[%c0_19, %c0_20, %c0_21, %c0_22], %33 {strides = array<i32>} : memref<1x4x8x128xf32, #tpu.memory_space<vmem>>, vector<1x4x8x128xf32>,
    } else {
    }
    %c1_i32_5 = arith.constant 1 : i32
    %11 = arith.cmpi eq, %arg3, %c1_i32_5 : i32
    %c0_i32_6 = arith.constant 0 : i32
    %12 = arith.cmpi eq, %arg4, %c0_i32_6 : i32
    %13 = arith.andi %11, %12 : i1
    %14 = arith.extui %13 : i1 to i32
    %c0_i32_7 = arith.constant 0 : i32
    %15 = arith.cmpi ne, %14, %c0_i32_7 : i32
    scf.if %15 {
      %c0 = arith.constant 0 : index
      %c0_8 = arith.constant 0 : index
      %c0_9 = arith.constant 0 : index
      %16 = vector.load %arg11[%c0, %c0_8, %c0_9] : memref<4x8x1xf32, #tpu.memory_space<vmem>>, vector<4x8x1xf32>
      %17 = tpu.reciprocal %16 {approx = true} : vector<4x8x1xf32> -> vector<4x8x1xf32>
      %c0_10 = arith.constant 0 : index
      %c0_11 = arith.constant 0 : index
      %c0_12 = arith.constant 0 : index
      %18 = vector.load %arg12[%c0_10, %c0_11, %c0_12] : memref<4x8x32xf32, #tpu.memory_space<vmem>>, vector<4x8x32xf32>
      %19 = vector.broadcast %17 : vector<4x8x1xf32> to vector<4x8x32xf32>
      %20 = arith.mulf %18, %19 : vector<4x8x32xf32>
      %c0_13 = arith.constant 0 : index
      %c0_14 = arith.constant 0 : index
      %c0_15 = arith.constant 0 : index
      %c0_16 = arith.constant 0 : index
      %21 = vector.load %arg8[%c0_13, %c0_14, %c0_15, %c0_16] : memref<1x4x8x32xf32, #tpu.memory_space<vmem>>, vector<1x4x8x32xf32>
      %22 = vector.shape_cast %21 : vector<1x4x8x32xf32> to vector<4x8x32xf32>
      %23 = vector.shape_cast %20 : vector<4x8x32xf32> to vector<1x4x8x32xf32>
      tpu.vector_store %arg8[%c0_13, %c0_14, %c0_15, %c0_16], %23 {strides = array<i32>} : memref<1x4x8x32xf32, #tpu.memory_space<vmem>>, vector<1x4x8x32xf32>,
    } else {
    }
    return
  }
  func.func @transform_0(%arg0: i32, %arg1: i32, %arg2: i32, %arg3: i32, %arg4: i32) -> (i32, i32, i32, i32) {
    %c0_i32 = arith.constant 0 : i32
    %c0_i32_0 = arith.constant 0 : i32
    return %arg0, %arg1, %arg2, %c0_i32 : i32, i32, i32, i32
  }
  func.func @transform_1(%arg0: i32, %arg1: i32, %arg2: i32, %arg3: i32, %arg4: i32) -> (i32, i32, i32, i32) {
    %c1_i32 = arith.constant 1 : i32
    %0 = arith.subi %c1_i32, %arg3 : i32
    %1 = arith.muli %arg4, %0 : i32
    %c0_i32 = arith.constant 0 : i32
    %2 = arith.muli %c0_i32, %arg3 : i32
    %3 = arith.addi %1, %2 : i32
    %c0_i32_0 = arith.constant 0 : i32
    %c0_i32_1 = arith.constant 0 : i32
    return %arg0, %arg1, %3, %c0_i32_0 : i32, i32, i32, i32
  }
  func.func @transform_2(%arg0: i32, %arg1: i32, %arg2: i32, %arg3: i32, %arg4: i32) -> (i32, i32, i32, i32) {
    %c1_i32 = arith.constant 1 : i32
    %0 = arith.subi %c1_i32, %arg3 : i32
    %1 = arith.muli %arg4, %0 : i32
    %c0_i32 = arith.constant 0 : i32
    %2 = arith.muli %c0_i32, %arg3 : i32
    %3 = arith.addi %1, %2 : i32
    %c0_i32_0 = arith.constant 0 : i32
    %c0_i32_1 = arith.constant 0 : i32
    return %arg0, %arg1, %3, %c0_i32_0 : i32, i32, i32, i32
  }
  func.func @transform_3(%arg0: i32, %arg1: i32, %arg2: i32, %arg3: i32, %arg4: i32) -> (i32, i32, i32, i32) {
    %c0_i32 = arith.constant 0 : i32
    %c0_i32_0 = arith.constant 0 : i32
    return %arg0, %arg1, %arg2, %c0_i32 : i32, i32, i32, i32
  }
  func.func @transform_4(%arg0: i32, %arg1: i32, %arg2: i32, %arg3: i32, %arg4: i32) -> (i32, i32, i32, i32) {
    %0 = arith.muli %arg4, %arg3 : i32
    %c0_i32 = arith.constant 0 : i32
    return %arg0, %arg1, %arg2, %0 : i32, i32, i32, i32
  }
}

</mosaic_0001>

<bundles_post_ra>
// kernel: tpu_custom_call.1
= control target key start
LH: loop header
LB: loop body
LE: loop exit
PB: predicated region body
PF: predicated region fallthrough
CT: control target
= control target key end

     0   :  { %10 = vsyncpa [#allocation8], 0  ;;  %s2666_s0 = inlined_call_operand.vmem [shape: f32[2,4,8,32], index: 0, kind: input, shape index: {}]   ;;  %s2667_s1 = inlined_call_operand.vmem [shape: f32[2,4,128,32], index: 1, kind: input, shape index: {}]   ;;  %s2668_s2 = inlined_call_operand.vmem [shape: f32[2,4,128,32], index: 2, kind: input, shape index: {}]   ;;  %s2669_s3 = inlined_call_operand.hbm [shape: f32[2,4,8,32], index: 3, kind: output, shape index: {0}]   ;;  %s2670_s4 = inlined_call_operand.hbm [shape: f32[2,4,8,128], index: 4, kind: output, shape index: {1}]  }
   0x1   :  { %12 = vsyncpa [#allocation8 + $0x1], 0 }
   0x2   :  { %13 = vsyncpa [#allocation10], 0 }
   0x3   :  { %15 = vsyncpa [#allocation10 + $0x1], 0  ;;  %s2137_s15 = smov 0   ;;  %s2139_s16 = smov 0  }
   0x4   :  { %s2141_s17 = smov 0   ;;  %s2143_s18 = smov 0  }
   0x5   :  { %s2145_s19 = smov 0   ;;  %s2147_s20 = smov 0  }
   0x6   :  { %s2149_s21 = smov 0   ;;  %s2151_s22 = smov 0  }
   0x7 LB: > { %2673 = sst [smem:[#allocation13_spill]] %s2095_s21  ;;  %s1578_s23 = sadd.s32 4294967295, %s2099_s22   ;;  %s2099_s22 = sphi %s2151_s22, %s21_s22   ;;  %s2095_s21 = sphi %s2149_s21, %s2680_s21   ;;  %s2091_s20 = sphi %s2147_s20, %s2685_s20   ;;  %s2087_s19 = sphi %s2145_s19, %s2678_s19   ;;  %s2083_s18 = sphi %s2143_s18, %s2684_s18   ;;  %s2079_s17 = sphi %s2141_s17, %s2683_s17   ;;  %s2075_s16 = sphi %s2139_s16, %s2682_s16   ;;  %s2071_s15 = sphi %s2137_s15, %s2681_s15  }
   0x8   : > { %s1579_s24 = sadd.s32 4294967294, %s2099_s22   ;;  %s42_s25 = sadd.s32 1, %s2091_s20 }
   0x9   : > { %p44_p0 = scmp.ge.s32.totalorder %s42_s25, 2  ;;  %s54_s26 = sadd.s32 1, %s2095_s21 }
   0xa   : > { %p173_p1 = scmp.ne.s32.totalorder %s2079_s17, %s2075_s16  ;;  %p174_p2 = scmp.eq.s32.totalorder %s1578_s23, 3 }
   0xb   : > { %s2687_s25 = smov (%p44_p0, %s42_s25), 0  ;;  %s2689_s26 = smov (!%p44_p0, %s54_s26), %s2095_s21 }
   0xc   : > { %2674 = sst [smem:[#allocation14_spill]] %s2687_s25  ;;  %p2186_p3 = por %p174_p2, %p173_p1 }
   0xd   : > { %p179_p4 = scmp.ne.s32.totalorder %s2075_s16, %s2071_s15  ;;  %p56_p5 = scmp.ge.s32.totalorder %s2689_s26, 2 }
   0xe   : > { %p180_p6 = scmp.eq.s32.totalorder %s1579_s24, 3  ;;  %p1582_p7 = scmp.ge.s32.totalorder %s2099_s22, 1 }
   0xf   : > { %p294_p8 = scmp.lt.s32.totalorder %s2099_s22, 5  ;;  %s2691_s26 = smov (%p56_p5, %s2689_s26), 0 }
  0x10   : > { %2676 = sst [smem:[#allocation15_spill]] %s2691_s26  ;;  %p2196_p9 = por %p180_p6, %p179_p4 }
  0x11   : > { %p295_p10 = pnand %p1582_p7, %p294_p8  ;;  %s156_s29 = ssub.s32 %s2095_s21, %s2691_s26 }
  0x12   : > { %s163_s30 = sadd.s32 1, %s2079_s17  ;;  %p161_p11 = scmp.eq.s32.totalorder %s156_s29, 0 }
  0x13   : > { %298 = sbr.rel (%p295_p10) target bundleno = 1206 (0x4b6), region = 32  ;;  %s2207_s6 = sand.u32 (!%p295_p10), 1, %s2075_s16  }
  0x14   : > { %s2204_s5 = scalar_select %p161_p11, %s2079_s17, %s163_s30  }
  0x15   : > { %p365_p12 = scmp.lt.s32.totalorder (!%p295_p10), %s2087_s19, 1  ;;  %s1583_s7 = sshll.u32 (!%p295_p10), %s2207_s6, 5 }
  0x16   : > { %p421_p13 = scmp.eq.s32.totalorder (!%p295_p10), %s2083_s18, 0  ;;  %s2228_s25 = scalar_lea.vmem (!%p295_p10), [#allocation7], %s1583_s7 }
  0x17   : > { %s2230_s21 = scalar_lea.vmem (!%p295_p10), [#allocation9], %s1583_s7 }
  0x18   : > { %s366_s8 = scalar_select %p365_p12, %s2087_s19, 1  ;;  %vm427_vm0 = vcmask (%p421_p13), 7168   ;;  %vm436_vm1 = vcmask (%p421_p13), 261120   ;;  %v2101_v0 = vmov (%p421_p13), -1e+30   ;;  %v2102_v1 = vmov (%p421_p13), 0.0  }
  0x19   : > { %426 = sbr.rel (!%p421_p13) target bundleno = 31 (0x1f), region = 36  ;;  %428 = vst.msk [vmem:[#allocation2] sm:$0xff] (%p421_p13), %vm427_vm0, %v2101_v0  ;;  %429 = vst.msk [vmem:[#allocation2 + $0x8] sm:$0xff] (%p421_p13), %vm427_vm0, %v2101_v0 }
  0x1a   : > { %s1607_s9 = sshll.u32 %s366_s8, 5  ;;  %s1608_s10 = sshll.u32 %s366_s8, 9  ;;  %430 = vst.msk [vmem:[#allocation2 + $0x10] sm:$0xff] (%p421_p13), %vm427_vm0, %v2101_v0  ;;  %431 = vst.msk [vmem:[#allocation2 + $0x18] sm:$0xff] (%p421_p13), %vm427_vm0, %v2101_v0 }
  0x1b   : > { %s2216_s13 = scalar_lea.vmem %s2666_s0, %s1607_s9  ;;  %s2221_s24 = scalar_lea.vmem %s2667_s1, %s1608_s10  ;;  %432 = vst.msk [vmem:[#allocation3] sm:$0xff] (%p421_p13), %vm427_vm0, %v2102_v1  ;;  %433 = vst.msk [vmem:[#allocation3 + $0x8] sm:$0xff] (%p421_p13), %vm427_vm0, %v2102_v1 }
  0x1c   : > { %s2226_s26 = scalar_lea.vmem %s2668_s2, %s1608_s10  ;;  %434 = vst.msk [vmem:[#allocation3 + $0x10] sm:$0xff] (%p421_p13), %vm427_vm0, %v2102_v1  ;;  %435 = vst.msk [vmem:[#allocation3 + $0x18] sm:$0xff] (%p421_p13), %vm427_vm0, %v2102_v1 }
  0x1d   : > { %437 = vst.msk [vmem:[#allocation4] sm:$0xff] (%p421_p13), %vm436_vm1, %v2102_v1  ;;  %438 = vst.msk [vmem:[#allocation4 + $0x8] sm:$0xff] (%p421_p13), %vm436_vm1, %v2102_v1 }
  0x1e   : > { %439 = vst.msk [vmem:[#allocation4 + $0x10] sm:$0xff] %vm436_vm1, %v2102_v1  ;;  %440 = vst.msk [vmem:[#allocation4 + $0x18] sm:$0xff] %vm436_vm1, %v2102_v1 }
  0x1f PF: > { %p1592_p0 = scmp.ne.s32.totalorder %s2083_s18, 0 }
  0x21   : > { %443 = sbr.rel (%p1592_p0) target bundleno = 850 (0x352), region = 40 }
  0x26   : > { %v466_v2 = vld [vmem:[%s2221_s24 + $0x70] sm:$0xff]  ;;  %v467_v3 = vld [vmem:[%s2221_s24 + $0x78] sm:$0xff]  ;;  %vm552_vm2 = vcmask 261120   ;;  %v2103_v5 = vmov 0.0   ;;  %v464_v9 = vld [vmem:[%s2221_s24 + $0x60] sm:$0xff]  ;;  %vm2104_vm3 = vmmov 0  }
  0x27   : > { %v482_v4 = vld [vmem:[%s2221_s24 + $0xf0] sm:$0xff]  ;;  %1686 = vmatprep.subr.bf16.mxu0 %v2103_v5  ;;  %1706 = vmatprep.subr.bf16.mxu1 %v2103_v5  ;;  %v527_v6 = vpack.c.bf16 %v467_v3, %v466_v2  ;;  %v483_v7 = vld [vmem:[%s2221_s24 + $0xf8] sm:$0xff]  ;;  %v465_v10 = vld [vmem:[%s2221_s24 + $0x68] sm:$0xff]  ;;  %vm975_vm5 = vcmask 7168  }
  0x28   : > { %v535_v8 = vpack.c.bf16 %v483_v7, %v482_v4  ;;  %1702 = vmatprep.mubr.msk.bf16.mxu0 %vm2104_vm3, %v2103_v5  ;;  %1722 = vmatprep.mubr.msk.bf16.mxu1 %vm2104_vm3, %v2103_v5  ;;  %v480_v12 = vld [vmem:[%s2221_s24 + $0xe0] sm:$0xff]  ;;  %v481_v13 = vld [vmem:[%s2221_s24 + $0xe8] sm:$0xff]  ;;  %v526_v15 = vpack.c.bf16 %v465_v10, %v464_v9  ;;  %v462_v19 = vld [vmem:[%s2221_s24 + $0x50] sm:$0xff] }
  0x29   : > { %v578_v11 = vsel %vm552_vm2, %v527_v6, 0  ;;  %v534_v16 = vpack.c.bf16 %v481_v13, %v480_v12  ;;  %v463_v20 = vld [vmem:[%s2221_s24 + $0x58] sm:$0xff]  ;;  %v478_v21 = vld [vmem:[%s2221_s24 + $0xd0] sm:$0xff]  ;;  %v460_v27 = vld [vmem:[%s2221_s24 + $0x40] sm:$0xff] }
  0x2a   : > { %1687 = vmatpush3.bf16.xpose.msra.mxu0 %v578_v11  ;;  %v645_v14 = vsel %vm552_vm2, %v535_v8, 0  ;;  %v575_v17 = vsel %vm552_vm2, %v526_v15, 0  ;;  %v479_v22 = vld [vmem:[%s2221_s24 + $0xd8] sm:$0xff]  ;;  %v525_v23 = vpack.c.bf16 %v463_v20, %v462_v19  ;;  %v461_v28 = vld [vmem:[%s2221_s24 + $0x48] sm:$0xff]  ;;  %v476_v29 = vld [vmem:[%s2221_s24 + $0xc0] sm:$0xff] }
  0x2b   : > { %1707 = vmatpush3.bf16.xpose.msra.mxu1 %v645_v14  ;;  %1688 = vmatprep.subr.bf16.mxu0 %v2103_v5  ;;  %v642_v18 = vsel %vm552_vm2, %v534_v16, 0  ;;  %v533_v24 = vpack.c.bf16 %v479_v22, %v478_v21  ;;  %v477_v30 = vld [vmem:[%s2221_s24 + $0xc8] sm:$0xff]  ;;  %v524_v31 = vpack.c.bf16 %v461_v28, %v460_v27  ;;  %v458_v35 = vld [vmem:[%s2221_s24 + $0x30] sm:$0xff]  ;;  %v459_v36 = vld [vmem:[%s2221_s24 + $0x38] sm:$0xff] }
  0x2c   : > { %1708 = vmatprep.subr.bf16.mxu1 %v2103_v5  ;;  %v572_v25 = vsel %vm552_vm2, %v525_v23, 0  ;;  %v532_v32 = vpack.c.bf16 %v477_v30, %v476_v29  ;;  %v474_v37 = vld [vmem:[%s2221_s24 + $0xb0] sm:$0xff]  ;;  %v475_v38 = vld [vmem:[%s2221_s24 + $0xb8] sm:$0xff]  ;;  %v523_v39 = vpack.c.bf16 %v459_v36, %v458_v35  ;;  %v456_v43 = vld [vmem:[%s2221_s24 + $0x20] sm:$0xff] }
  0x2d   : > { %v639_v26 = vsel %vm552_vm2, %v533_v24, 0  ;;  %v569_v33 = vsel %vm552_vm2, %v524_v31, 0  ;;  %v531_v40 = vpack.c.bf16 %v475_v38, %v474_v37  ;;  %v457_v44 = vld [vmem:[%s2221_s24 + $0x28] sm:$0xff]  ;;  %v472_v45 = vld [vmem:[%s2221_s24 + $0xa0] sm:$0xff]  ;;  %v454_v51 = vld [vmem:[%s2221_s24 + $0x10] sm:$0xff] }
  0x2e   : > { %v636_v34 = vsel %vm552_vm2, %v532_v32, 0  ;;  %v566_v41 = vsel %vm552_vm2, %v523_v39, 0  ;;  %v473_v46 = vld [vmem:[%s2221_s24 + $0xa8] sm:$0xff]  ;;  %v522_v47 = vpack.c.bf16 %v457_v44, %v456_v43  ;;  %v455_v52 = vld [vmem:[%s2221_s24 + $0x18] sm:$0xff]  ;;  %v470_v53 = vld [vmem:[%s2221_s24 + $0x90] sm:$0xff] }
  0x2f   : > { %v633_v42 = vsel %vm552_vm2, %v531_v40, 0  ;;  %v530_v48 = vpack.c.bf16 %v473_v46, %v472_v45  ;;  %v471_v54 = vld [vmem:[%s2221_s24 + $0x98] sm:$0xff]  ;;  %v521_v55 = vpack.c.bf16 %v455_v52, %v454_v51  ;;  %v452_v59 = vld [vmem:[%s2221_s24] sm:$0xff]  ;;  %v453_v60 = vld [vmem:[%s2221_s24 + $0x8] sm:$0xff] }
  0x30   : > { %v563_v49 = vsel %vm552_vm2, %v522_v47, 0  ;;  %v529_v56 = vpack.c.bf16 %v471_v54, %v470_v53  ;;  %v468_v61 = vld [vmem:[%s2221_s24 + $0x80] sm:$0xff]  ;;  %v469_v62 = vld [vmem:[%s2221_s24 + $0x88] sm:$0xff]  ;;  %v520_v63 = vpack.c.bf16 %v453_v60, %v452_v59  ;;  %v498_v6 = vld [vmem:[%s2221_s24 + $0x170] sm:$0xff] }
  0x31   : > { %v630_v50 = vsel %vm552_vm2, %v530_v48, 0  ;;  %v560_v57 = vsel %vm552_vm2, %v521_v55, 0  ;;  %v528_v0 = vpack.c.bf16 %v469_v62, %v468_v61  ;;  %v444_v1 = vld [vmem:[%s2216_s13] sm:$0xff]  ;;  %v445_v3 = vld [vmem:[%s2216_s13 + $0x8] sm:$0xff]  ;;  %v499_v7 = vld [vmem:[%s2221_s24 + $0x178] sm:$0xff] }
  0x32   : > { %1689 = vmatpush3.bf16.xpose.msra.mxu0 %v575_v17  ;;  %v627_v58 = vsel %vm552_vm2, %v529_v56, 0  ;;  %v557_v2 = vsel %vm552_vm2, %v520_v63, 0  ;;  %v448_v8 = vmul.f32 0.17677669, %v444_v1  ;;  %v514_v9 = vld [vmem:[%s2221_s24 + $0x1f0] sm:$0xff]  ;;  %v515_v10 = vld [vmem:[%s2221_s24 + $0x1f8] sm:$0xff]  ;;  %v543_v12 = vpack.c.bf16 %v499_v7, %v498_v6 }
  0x33   : > { %1709 = vmatpush3.bf16.xpose.msra.mxu1 %v642_v18  ;;  %1690 = vmatprep.subr.bf16.mxu0 %v2103_v5  ;;  %v624_v4 = vsel %vm552_vm2, %v528_v0, 0  ;;  %v449_v11 = vmul.f32 0.17677669, %v445_v3  ;;  %v551_v13 = vpack.c.bf16 %v515_v10, %v514_v9  ;;  %v496_v18 = vld [vmem:[%s2221_s24 + $0x160] sm:$0xff]  ;;  %v497_v19 = vld [vmem:[%s2221_s24 + $0x168] sm:$0xff]  ;;  %v495_v27 = vld [vmem:[%s2221_s24 + $0x158] sm:$0xff] }
  0x34   : > { %1710 = vmatprep.subr.bf16.mxu1 %v2103_v5  ;;  %v516_v14 = vpack.c.bf16 %v448_v8, %v448_v8  ;;  %v712_v16 = vsel %vm552_vm2, %v543_v12, 0  ;;  %v512_v20 = vld [vmem:[%s2221_s24 + $0x1e0] sm:$0xff]  ;;  %v513_v21 = vld [vmem:[%s2221_s24 + $0x1e8] sm:$0xff]  ;;  %v542_v22 = vpack.c.bf16 %v497_v19, %v496_v18  ;;  %v510_v28 = vld [vmem:[%s2221_s24 + $0x1d0] sm:$0xff] }
  0x35   : > { %v517_v15 = vpack.c.bf16 %v449_v11, %v449_v11  ;;  %v779_v17 = vsel %vm552_vm2, %v551_v13, 0  ;;  %v550_v23 = vpack.c.bf16 %v513_v21, %v512_v20  ;;  %v511_v29 = vld [vmem:[%s2221_s24 + $0x1d8] sm:$0xff]  ;;  %v493_v35 = vld [vmem:[%s2221_s24 + $0x148] sm:$0xff]  ;;  %v508_v36 = vld [vmem:[%s2221_s24 + $0x1c0] sm:$0xff] }
  0x36   : > { %v709_v24 = vsel %vm552_vm2, %v542_v22, 0  ;;  %v549_v31 = vpack.c.bf16 %v511_v29, %v510_v28  ;;  %v509_v37 = vld [vmem:[%s2221_s24 + $0x1c8] sm:$0xff]  ;;  %v491_v43 = vld [vmem:[%s2221_s24 + $0x138] sm:$0xff]  ;;  %v506_v44 = vld [vmem:[%s2221_s24 + $0x1b0] sm:$0xff]  ;;  %v2105_v29 = vmov 0  }
  0x37   : > { %v548_v39 = vpack.c.bf16 %v509_v37, %v508_v36  ;;  %v507_v45 = vld [vmem:[%s2221_s24 + $0x1b8] sm:$0xff]  ;;  %v489_v51 = vld [vmem:[%s2221_s24 + $0x128] sm:$0xff]  ;;  %v504_v52 = vld [vmem:[%s2221_s24 + $0x1a0] sm:$0xff]  ;;  %1931 = vset.pattern.permute.xlu0 %v2105_v29  ;;  %1932 = vset.pattern.permute.xlu1 %v2105_v29 }
  0x38   : > { %v547_v47 = vpack.c.bf16 %v507_v45, %v506_v44  ;;  %v505_v53 = vld [vmem:[%s2221_s24 + $0x1a8] sm:$0xff]  ;;  %v487_v59 = vld [vmem:[%s2221_s24 + $0x118] sm:$0xff]  ;;  %v502_v60 = vld [vmem:[%s2221_s24 + $0x190] sm:$0xff] }
  0x39   : > { %v546_v55 = vpack.c.bf16 %v505_v53, %v504_v52  ;;  %v503_v61 = vld [vmem:[%s2221_s24 + $0x198] sm:$0xff]  ;;  %v485_v3 = vld [vmem:[%s2221_s24 + $0x108] sm:$0xff]  ;;  %v446_v9 = vld [vmem:[%s2216_s13 + $0x10] sm:$0xff] }
  0x3a   : > { %1691 = vmatpush3.bf16.xpose.msra.mxu0 %v572_v25  ;;  %v776_v25 = vsel %vm552_vm2, %v550_v23, 0  ;;  %v545_v63 = vpack.c.bf16 %v503_v61, %v502_v60  ;;  %v501_v6 = vld [vmem:[%s2221_s24 + $0x188] sm:$0xff]  ;;  %v447_v11 = vld [vmem:[%s2216_s13 + $0x18] sm:$0xff]  ;;  %v450_v13 = vmul.f32 0.17677669, %v446_v9  ;;  %v861_v45 = vld [vmem:[%s2226_s26 + $0xf0] sm:$0xff] }
  0x3b   : > { %1711 = vmatpush3.bf16.xpose.msra.mxu1 %v639_v26  ;;  %1692 = vmatprep.subr.bf16.mxu0 %v2103_v5  ;;  %v494_v26 = vld [vmem:[%s2221_s24 + $0x150] sm:$0xff]  ;;  %v844_v44 = vld [vmem:[%s2226_s26 + $0x68] sm:$0xff]  ;;  %v842_v52 = vld [vmem:[%s2226_s26 + $0x58] sm:$0xff] }
  0x3c   : > { %1712 = vmatprep.subr.bf16.mxu1 %v2103_v5  ;;  %v541_v30 = vpack.c.bf16 %v495_v27, %v494_v26  ;;  %v761_v1 = vsel %vm552_vm2, %v545_v63, 0  ;;  %v858_v60 = vld [vmem:[%s2226_s26 + $0xd8] sm:$0xff] }
  0x3d   : > { %v850_v29 = vld [vmem:[%s2226_s26 + $0x98] sm:$0xff] }
  0x3e   : > { %v706_v32 = vsel %vm552_vm2, %v541_v30, 0 }
  0x42   : > { %1693 = vmatpush3.bf16.xpose.msra.mxu0 %v569_v33  ;;  %v773_v33 = vsel %vm552_vm2, %v549_v31, 0 }
  0x43   : > { %1713 = vmatpush3.bf16.xpose.msra.mxu1 %v636_v34  ;;  %1694 = vmatprep.subr.bf16.mxu0 %v2103_v5  ;;  %v492_v34 = vld [vmem:[%s2221_s24 + $0x140] sm:$0xff] }
  0x44   : > { %1714 = vmatprep.subr.bf16.mxu1 %v2103_v5  ;;  %v540_v38 = vpack.c.bf16 %v493_v35, %v492_v34 }
  0x46   : > { %v703_v40 = vsel %vm552_vm2, %v540_v38, 0 }
  0x4a   : > { %1695 = vmatpush3.bf16.xpose.msra.mxu0 %v566_v41  ;;  %v770_v41 = vsel %vm552_vm2, %v548_v39, 0 }
  0x4b   : > { %1715 = vmatpush3.bf16.xpose.msra.mxu1 %v633_v42  ;;  %1696 = vmatprep.subr.bf16.mxu0 %v2103_v5  ;;  %v490_v42 = vld [vmem:[%s2221_s24 + $0x130] sm:$0xff] }
  0x4c   : > { %1716 = vmatprep.subr.bf16.mxu1 %v2103_v5  ;;  %v539_v46 = vpack.c.bf16 %v491_v43, %v490_v42  ;;  %v843_v42 = vld [vmem:[%s2226_s26 + $0x60] sm:$0xff] }
  0x4e   : > { %v700_v48 = vsel %vm552_vm2, %v539_v46, 0  ;;  %v862_v46 = vld [vmem:[%s2226_s26 + $0xf8] sm:$0xff] }
  0x52   : > { %1697 = vmatpush3.bf16.xpose.msra.mxu0 %v563_v49  ;;  %v767_v49 = vsel %vm552_vm2, %v547_v47, 0  ;;  %v1027_v47 = vpack.c.bf16 %v862_v46, %v861_v45 }
  0x53   : > { %1717 = vmatpush3.bf16.xpose.msra.mxu1 %v630_v50  ;;  %1698 = vmatprep.subr.bf16.mxu0 %v2103_v5  ;;  %v488_v50 = vld [vmem:[%s2221_s24 + $0x120] sm:$0xff] }
  0x54   : > { %1718 = vmatprep.subr.bf16.mxu1 %v2103_v5  ;;  %v538_v54 = vpack.c.bf16 %v489_v51, %v488_v50  ;;  %v860_v50 = vld [vmem:[%s2226_s26 + $0xe8] sm:$0xff]  ;;  %v841_v51 = vld [vmem:[%s2226_s26 + $0x50] sm:$0xff] }
  0x56   : > { %v697_v56 = vsel %vm552_vm2, %v538_v54, 0  ;;  %v1017_v54 = vpack.c.bf16 %v842_v52, %v841_v51 }
  0x5a   : > { %1699 = vmatpush3.bf16.xpose.msra.mxu0 %v560_v57  ;;  %v764_v57 = vsel %vm552_vm2, %v546_v55, 0  ;;  %v2414_v55 = vld [vmem:[#allocation2] sm:$0xff] }
  0x5b   : > { %1719 = vmatpush3.bf16.xpose.msra.mxu1 %v627_v58  ;;  %1700 = vmatprep.subr.bf16.mxu0 %v2103_v5  ;;  %v486_v58 = vld [vmem:[%s2221_s24 + $0x110] sm:$0xff] }
  0x5c   : > { %1720 = vmatprep.subr.bf16.mxu1 %v2103_v5  ;;  %v537_v62 = vpack.c.bf16 %v487_v59, %v486_v58  ;;  %v857_v58 = vld [vmem:[%s2226_s26 + $0xd0] sm:$0xff] }
  0x5e   : > { %v694_v0 = vsel %vm552_vm2, %v537_v62, 0  ;;  %v1025_v62 = vpack.c.bf16 %v858_v60, %v857_v58  ;;  %v875_v58 = vld [vmem:[%s2226_s26 + $0x160] sm:$0xff]  ;;  %v893_v60 = vld [vmem:[%s2226_s26 + $0x1f0] sm:$0xff] }
  0x62   : > { %1701 = vmatpush3.bf16.xpose.msra.mxu0 %v557_v2  ;;  %v484_v2 = vld [vmem:[%s2221_s24 + $0x100] sm:$0xff] }
  0x63   : > { %1721 = vmatpush3.bf16.xpose.msra.mxu1 %v624_v4  ;;  %1726 = vmatprep.subr.bf16.mxu0 %v2103_v5  ;;  %v500_v4 = vld [vmem:[%s2221_s24 + $0x180] sm:$0xff]  ;;  %v536_v7 = vpack.c.bf16 %v485_v3, %v484_v2  ;;  %v838_v2 = vld [vmem:[%s2226_s26 + $0x38] sm:$0xff] }
  0x64   : > { %1746 = vmatprep.subr.bf16.mxu1 %v2103_v5  ;;  %v544_v8 = vpack.c.bf16 %v501_v6, %v500_v4  ;;  %v855_v3 = vld [vmem:[%s2226_s26 + $0xc0] sm:$0xff]  ;;  %v856_v6 = vld [vmem:[%s2226_s26 + $0xc8] sm:$0xff] }
  0x65   : > { %v691_v10 = vsel %vm552_vm2, %v536_v7, 0 }
  0x66   : > { %v758_v12 = vsel %vm552_vm2, %v544_v8, 0  ;;  %v1024_v8 = vpack.c.bf16 %v856_v6, %v855_v3  ;;  %v874_v3 = vld [vmem:[%s2226_s26 + $0x158] sm:$0xff]  ;;  %v892_v6 = vld [vmem:[%s2226_s26 + $0x1e8] sm:$0xff] }
  0x69   : > { %1703 = vmatmul.mubr.msk.bf16.vlgmr.msra.gmra.mxu0 %vm552_vm2, %v516_v14  ;;  %v451_v14 = vmul.f32 0.17677669, %v447_v11  ;;  %v836_v11 = vld [vmem:[%s2226_s26 + $0x28] sm:$0xff] }
  0x6a   : > { %1723 = vmatmul.mubr.msk.bf16.vlgmr.msra.gmra.mxu1 %vm552_vm2, %v517_v15  ;;  %1727 = vmatpush3.bf16.xpose.msra.mxu0 %v712_v16  ;;  %v518_v15 = vpack.c.bf16 %v450_v13, %v450_v13 }
  0x6b   : > { %1747 = vmatpush3.bf16.xpose.msra.mxu1 %v779_v17  ;;  %1728 = vmatprep.subr.bf16.mxu0 %v2103_v5  ;;  %v519_v16 = vpack.c.bf16 %v451_v14, %v451_v14  ;;  %v821_v17 = vlaneseq }
  0x6c   : > { %1748 = vmatprep.subr.bf16.mxu1 %v2103_v5  ;;  %1742 = vmatprep.mubr.msk.bf16.mxu0 %vm2104_vm3, %v2103_v5 }
  0x6d   : > { %1762 = vmatprep.mubr.msk.bf16.mxu1 %vm2104_vm3, %v2103_v5  ;;  %v822_v18 = vand.u32 127, %v821_v17  ;;  %v833_v17 = vld [vmem:[%s2226_s26 + $0x10] sm:$0xff] }
  0x6f   : > { %vm826_vm4 = vcmp.lt.s32.totalorder %v822_v18, 8  ;;  %v834_v18 = vld [vmem:[%s2226_s26 + $0x18] sm:$0xff] }
  0x72   : > { %1729 = vmatpush3.bf16.xpose.msra.mxu0 %v709_v24 }
  0x73   : > { %1749 = vmatpush3.bf16.xpose.msra.mxu1 %v776_v25  ;;  %1730 = vmatprep.subr.bf16.mxu0 %v2103_v5 }
  0x74   : > { %1750 = vmatprep.subr.bf16.mxu1 %v2103_v5 }
  0x7a   : > { %1731 = vmatpush3.bf16.xpose.msra.mxu0 %v706_v32 }
  0x7b   : > { %1751 = vmatpush3.bf16.xpose.msra.mxu1 %v773_v33  ;;  %1732 = vmatprep.subr.bf16.mxu0 %v2103_v5 }
  0x7c   : > { %1752 = vmatprep.subr.bf16.mxu1 %v2103_v5 }
  0x82   : > { %1733 = vmatpush3.bf16.xpose.msra.mxu0 %v703_v40  ;;  %v845_v40 = vld [vmem:[%s2226_s26 + $0x70] sm:$0xff] }
  0x83   : > { %1753 = vmatpush3.bf16.xpose.msra.mxu1 %v770_v41  ;;  %1734 = vmatprep.subr.bf16.mxu0 %v2103_v5  ;;  %v846_v41 = vld [vmem:[%s2226_s26 + $0x78] sm:$0xff] }
  0x84   : > { %1754 = vmatprep.subr.bf16.mxu1 %v2103_v5  ;;  %v1019_v43 = vpack.c.bf16 %v846_v41, %v845_v40  ;;  %v2465_v41 = vld [vmem:[#allocation2 + $0x18] sm:$0xff] }
  0x8a   : > { %1735 = vmatpush3.bf16.xpose.msra.mxu0 %v700_v48  ;;  %v859_v48 = vld [vmem:[%s2226_s26 + $0xe0] sm:$0xff] }
  0x8b   : > { %1755 = vmatpush3.bf16.xpose.msra.mxu1 %v767_v49  ;;  %1736 = vmatprep.subr.bf16.mxu0 %v2103_v5  ;;  %v1018_v49 = vpack.c.bf16 %v844_v44, %v843_v42  ;;  %v1026_v53 = vpack.c.bf16 %v860_v50, %v859_v48 }
  0x8c   : > { %1756 = vmatprep.subr.bf16.mxu1 %v2103_v5 }
  0x92   : > { %1737 = vmatpush3.bf16.xpose.msra.mxu0 %v697_v56  ;;  %v839_v56 = vld [vmem:[%s2226_s26 + $0x40] sm:$0xff] }
  0x93   : > { %1757 = vmatpush3.bf16.xpose.msra.mxu1 %v764_v57  ;;  %1738 = vmatprep.subr.bf16.mxu0 %v2103_v5  ;;  %v840_v57 = vld [vmem:[%s2226_s26 + $0x48] sm:$0xff] }
  0x94   : > { %1758 = vmatprep.subr.bf16.mxu1 %v2103_v5  ;;  %v1016_v59 = vpack.c.bf16 %v840_v57, %v839_v56 }
  0x9a   : > { %1739 = vmatpush3.bf16.xpose.msra.mxu0 %v694_v0  ;;  %v2421_v0 = vld [vmem:[#allocation2 + $0x8] sm:$0xff] }
  0x9b   : > { %1759 = vmatpush3.bf16.xpose.msra.mxu1 %v761_v1  ;;  %1740 = vmatprep.subr.bf16.mxu0 %v2103_v5  ;;  %v837_v1 = vld [vmem:[%s2226_s26 + $0x30] sm:$0xff] }
  0x9c   : > { %1760 = vmatprep.subr.bf16.mxu1 %v2103_v5  ;;  %v1015_v4 = vpack.c.bf16 %v838_v2, %v837_v1  ;;  %v873_v1 = vld [vmem:[%s2226_s26 + $0x150] sm:$0xff] }
  0xa2   : > { %1741 = vmatpush3.bf16.xpose.msra.mxu0 %v691_v10  ;;  %v835_v10 = vld [vmem:[%s2226_s26 + $0x20] sm:$0xff] }
  0xa3   : > { %1761 = vmatpush3.bf16.xpose.msra.mxu1 %v758_v12  ;;  %1766 = vmatprep.subr.bf16.mxu0 %v2103_v5  ;;  %v853_v12 = vld [vmem:[%s2226_s26 + $0xb0] sm:$0xff]  ;;  %v1014_v14 = vpack.c.bf16 %v836_v11, %v835_v10  ;;  %v871_v10 = vld [vmem:[%s2226_s26 + $0x140] sm:$0xff] }
  0xa4   : > { %1786 = vmatprep.subr.bf16.mxu1 %v2103_v5 }
  0xa9   : > { %1743 = vmatmul.mubr.msk.bf16.vlgmr.msra.gmra.mxu0 %vm552_vm2, %v518_v15  ;;  %v854_v15 = vld [vmem:[%s2226_s26 + $0xb8] sm:$0xff] }
  0xaa   : > { %1763 = vmatmul.mubr.msk.bf16.vlgmr.msra.gmra.mxu1 %vm552_vm2, %v519_v16  ;;  %1782 = vmatprep.mubr.msk.bf16.mxu0 %vm2104_vm3, %v2103_v5  ;;  %v1023_v16 = vpack.c.bf16 %v854_v15, %v853_v12  ;;  %v872_v12 = vld [vmem:[%s2226_s26 + $0x148] sm:$0xff]  ;;  %v890_v15 = vld [vmem:[%s2226_s26 + $0x1d8] sm:$0xff] }
  0xab   : > { %1802 = vmatprep.mubr.msk.bf16.mxu1 %vm2104_vm3, %v2103_v5  ;;  %1767 = vmatpush3.bf16.msra.mxu0 %v1019_v43 }
  0xac   : > { %1768 = vmatprep.subr.bf16.mxu0 %v2103_v5  ;;  %1787 = vmatpush3.bf16.msra.mxu1 %v1027_v47 }
  0xad   : > { %1788 = vmatprep.subr.bf16.mxu1 %v2103_v5 }
  0xaf   : > { %1769 = vmatpush3.bf16.msra.mxu0 %v1018_v49 }
  0xb0   : > { %1770 = vmatprep.subr.bf16.mxu0 %v2103_v5  ;;  %1789 = vmatpush3.bf16.msra.mxu1 %v1026_v53  ;;  %v877_v53 = vld [vmem:[%s2226_s26 + $0x170] sm:$0xff] }
  0xb1   : > { %1790 = vmatprep.subr.bf16.mxu1 %v2103_v5 }
  0xb3   : > { %1771 = vmatpush3.bf16.msra.mxu0 %v1017_v54  ;;  %v878_v54 = vld [vmem:[%s2226_s26 + $0x178] sm:$0xff] }
  0xb4   : > { %1772 = vmatprep.subr.bf16.mxu0 %v2103_v5  ;;  %1791 = vmatpush3.bf16.msra.mxu1 %v1025_v62  ;;  %v1035_v57 = vpack.c.bf16 %v878_v54, %v877_v53 }
  0xb5   : > { %1792 = vmatprep.subr.bf16.mxu1 %v2103_v5 }
  0xb7   : > { %1773 = vmatpush3.bf16.msra.mxu0 %v1016_v59  ;;  %v876_v59 = vld [vmem:[%s2226_s26 + $0x168] sm:$0xff] }
  0xb8   : > { %1774 = vmatprep.subr.bf16.mxu0 %v2103_v5  ;;  %1793 = vmatpush3.bf16.msra.mxu1 %v1024_v8  ;;  %v1034_v62 = vpack.c.bf16 %v876_v59, %v875_v58 }
  0xb9   : > { %1794 = vmatprep.subr.bf16.mxu1 %v2103_v5 }
  0xbb   : > { %1775 = vmatpush3.bf16.msra.mxu0 %v1015_v4  ;;  %v891_v4 = vld [vmem:[%s2226_s26 + $0x1e0] sm:$0xff] }
  0xbc   : > { %1776 = vmatprep.subr.bf16.mxu0 %v2103_v5  ;;  %1795 = vmatpush3.bf16.msra.mxu1 %v1023_v16  ;;  %v1042_v8 = vpack.c.bf16 %v892_v6, %v891_v4  ;;  %v1032_v16 = vpack.c.bf16 %v872_v12, %v871_v10  ;;  %v981_v4 = vld [vmem:[#allocation4 + $0x8] sm:$0xff] }
  0xbd   : > { %1796 = vmatprep.subr.bf16.mxu1 %v2103_v5 }
  0xbf   : > { %1777 = vmatpush3.bf16.msra.mxu0 %v1014_v14  ;;  %v889_v14 = vld [vmem:[%s2226_s26 + $0x1d0] sm:$0xff] }
  0xc0   : > { %1778 = vmatprep.subr.bf16.mxu0 %v2103_v5 }
 0x129   : > { %v614_v19 = vpop.f32.mrf.mxu0 }
 0x12a   : > { %v681_v20 = vpop.f32.mrf.mxu1  ;;  %v2384_v21 = vsel %vm826_vm4, %v614_v19, -1e+30  ;;  %v851_v19 = vld [vmem:[%s2226_s26 + $0xa0] sm:$0xff] }
 0x12b   : > { %899 = vmax.xlane.f32.xlu0 %v2384_v21  ;;  %v1704_v22 = vpop.f32.mrf.mxu0  ;;  %v2388_v24 = vsel %vm826_vm4, %v681_v20, -1e+30  ;;  %v1013_v20 = vpack.c.bf16 %v834_v18, %v833_v17  ;;  %v1041_v17 = vpack.c.bf16 %v890_v15, %v889_v14  ;;  %v888_v18 = vld [vmem:[%s2226_s26 + $0x1c8] sm:$0xff] }
 0x12c   : > { %v1724_v23 = vpop.f32.mrf.mxu1  ;;  %v852_v22 = vld [vmem:[%s2226_s26 + $0xa8] sm:$0xff] }
 0x12d   : > { %v617_v25 = vpop.f32.mrf.mxu0  ;;  %v1022_v23 = vpack.c.bf16 %v852_v22, %v851_v19  ;;  %1779 = vmatpush3.bf16.msra.mxu0 %v1013_v20  ;;  %v867_v22 = vld [vmem:[%s2226_s26 + $0x120] sm:$0xff] }
 0x12e   : > { %v684_v26 = vpop.f32.mrf.mxu1  ;;  %1780 = vmatprep.subr.bf16.mxu0 %v2103_v5  ;;  %v831_v25 = vld [vmem:[%s2226_s26] sm:$0xff] }
 0x12f   : > { %901 = vmax.xlane.f32.xlu0 %v2388_v24  ;;  %v1705_v27 = vpop.f32.mrf.mxu0  ;;  %1797 = vmatpush3.bf16.msra.mxu1 %v1022_v23  ;;  %v832_v26 = vld [vmem:[%s2226_s26 + $0x8] sm:$0xff] }
 0x130   : > { %v1725_v28 = vpop.f32.mrf.mxu1  ;;  %v849_v27 = vld [vmem:[%s2226_s26 + $0x90] sm:$0xff]  ;;  %1798 = vmatprep.subr.bf16.mxu1 %v2103_v5 }
 0x131   : > { %v1012_v28 = vpack.c.bf16 %v832_v26, %v831_v25  ;;  %v868_v25 = vld [vmem:[%s2226_s26 + $0x128] sm:$0xff]  ;;  %v885_v26 = vld [vmem:[%s2226_s26 + $0x1b0] sm:$0xff] }
 0x133   : > { %1781 = vmatpush3.bf16.msra.mxu0 %v1012_v28  ;;  %v1030_v28 = vpack.c.bf16 %v868_v25, %v867_v22 }
 0x134   : > { %1806 = vmatprep.subr.bf16.mxu0 %v2103_v5 }
 0x169   : > { %v748_v30 = vpop.f32.mrf.mxu0 }
 0x16a   : > { %v815_v31 = vpop.f32.mrf.mxu1  ;;  %v2392_v32 = vsel %vm826_vm4, %v748_v30, -1e+30  ;;  %v1021_v30 = vpack.c.bf16 %v850_v29, %v849_v27  ;;  %v886_v27 = vld [vmem:[%s2226_s26 + $0x1b8] sm:$0xff] }
 0x16b   : > { %903 = vmax.xlane.f32.xlu1 %v2392_v32  ;;  %v1744_v33 = vpop.f32.mrf.mxu0  ;;  %v2396_v35 = vsel %vm826_vm4, %v815_v31, -1e+30  ;;  %v847_v31 = vld [vmem:[%s2226_s26 + $0x80] sm:$0xff]  ;;  %v1039_v29 = vpack.c.bf16 %v886_v27, %v885_v26 }
 0x16c   : > { %v1764_v34 = vpop.f32.mrf.mxu1  ;;  %1799 = vmatpush3.bf16.msra.mxu1 %v1021_v30  ;;  %v848_v33 = vld [vmem:[%s2226_s26 + $0x88] sm:$0xff]  ;;  %v865_v30 = vld [vmem:[%s2226_s26 + $0x110] sm:$0xff] }
 0x16d   : > { %v751_v36 = vpop.f32.mrf.mxu0  ;;  %1800 = vmatprep.subr.bf16.mxu1 %v2103_v5  ;;  %v1020_v34 = vpack.c.bf16 %v848_v33, %v847_v31  ;;  %v866_v31 = vld [vmem:[%s2226_s26 + $0x118] sm:$0xff]  ;;  %v883_v33 = vld [vmem:[%s2226_s26 + $0x1a0] sm:$0xff] }
 0x16e   : > { %v818_v37 = vpop.f32.mrf.mxu1 }
 0x16f   : > { %905 = vmax.xlane.f32.xlu1 %v2396_v35  ;;  %v1745_v38 = vpop.f32.mrf.mxu0 }
 0x170   : > { %v1765_v39 = vpop.f32.mrf.mxu1  ;;  %1801 = vmatpush3.bf16.msra.mxu1 %v1020_v34  ;;  %v897_v38 = vld [vmem:[#allocation2 + $0x10] sm:$0xff]  ;;  %v884_v34 = vld [vmem:[%s2226_s26 + $0x1a8] sm:$0xff] }
 0x171   : > { %1826 = vmatprep.subr.bf16.mxu1 %v2103_v5 }
 0x1b4   : > { %v900_v61 = vpop.xlane.xlu0 %899 }
 0x1b5   : > { %v907_v63 = vmax.f32 %v2414_v55, %v900_v61  ;;  %v894_v61 = vld [vmem:[%s2226_s26 + $0x1f8] sm:$0xff] }
 0x1b7   : > { %1212 = vst.msk [vmem:[#allocation2] sm:$0xff] %vm975_vm5, %v907_v63  ;;  %1223 = vst.msk [vmem:[#allocation6] sm:$0xff] %vm975_vm5, %v907_v63  ;;  %925 = vperm.xlu0 %1931, %v907_v63   ;;  %v911_v36 = vsub.f32 %v2414_v55, %v907_v63  ;;  %v1043_v63 = vpack.c.bf16 %v894_v61, %v893_v60  ;;  %v955_v61 = vld [vmem:[#allocation3] sm:$0xff] }
 0x1b8   : > { %v902_v7 = vpop.xlane.xlu0 %901 }
 0x1b9   : > { %v2432_v9 = vmax.f32 %v2421_v0, %v902_v7  ;;  %v915_v37 = vmul.f32 1.442695, %v911_v36  ;;  %v1033_v7 = vpack.c.bf16 %v874_v3, %v873_v1  ;;  %v1029_v36 = vpack.c.bf16 %v866_v31, %v865_v30  ;;  %v983_v30 = vld [vmem:[#allocation4 + $0x18] sm:$0xff] }
 0x1bb   : > { %v912_v13 = vsub.f32 %v2421_v0, %v2432_v9  ;;  %1213 = vst.msk [vmem:[#allocation2 + $0x8] sm:$0xff] %vm975_vm5, %v2432_v9  ;;  %1224 = vst.msk [vmem:[#allocation6 + $0x8] sm:$0xff] %vm975_vm5, %v2432_v9  ;;  %930 = vperm.xlu1 %1932, %v2432_v9   ;;  %1933 = vpow2.f32 %v915_v37  ;;  %v869_v0 = vld [vmem:[%s2226_s26 + $0x130] sm:$0xff]  ;;  %v870_v9 = vld [vmem:[%s2226_s26 + $0x138] sm:$0xff]  ;;  %v1038_v37 = vpack.c.bf16 %v884_v34, %v883_v33 }
 0x1bc   : > { %v1031_v19 = vpack.c.bf16 %v870_v9, %v869_v0 }
 0x1bd   : > { %v917_v11 = vmul.f32 1.442695, %v912_v13  ;;  %v887_v13 = vld [vmem:[%s2226_s26 + $0x1c0] sm:$0xff] }
 0x1be   : > { %v1040_v20 = vpack.c.bf16 %v888_v18, %v887_v13  ;;  %v958_v18 = vld [vmem:[#allocation3 + $0x18] sm:$0xff] }
 0x1c8   : > { %v2479_v46 = vpop.eup %1933 }
 0x1f4   : > { %v904_v39 = vpop.xlane.xlu1 %903 }
 0x1f5   : > { %v909_v40 = vmax.f32 %v897_v38, %v904_v39  ;;  %v864_v39 = vld [vmem:[%s2226_s26 + $0x108] sm:$0xff] }
 0x1f7   : > { %v913_v42 = vsub.f32 %v897_v38, %v909_v40  ;;  %1214 = vst.msk [vmem:[#allocation2 + $0x10] sm:$0xff] %vm975_vm5, %v909_v40  ;;  %1225 = vst.msk [vmem:[#allocation6 + $0x10] sm:$0xff] %vm975_vm5, %v909_v40  ;;  %935 = vperm.xlu1 %1932, %v909_v40   ;;  %v863_v38 = vld [vmem:[%s2226_s26 + $0x100] sm:$0xff]  ;;  %v881_v40 = vld [vmem:[%s2226_s26 + $0x190] sm:$0xff] }
 0x1f8   : > { %v906_v43 = vpop.xlane.xlu1 %905 }
 0x1f9   : > { %v2470_v44 = vmax.f32 %v2465_v41, %v906_v43  ;;  %v919_v56 = vmul.f32 1.442695, %v913_v42  ;;  %v882_v42 = vld [vmem:[%s2226_s26 + $0x198] sm:$0xff] }
 0x1fb   : > { %v914_v45 = vsub.f32 %v2465_v41, %v2470_v44  ;;  %1215 = vst.msk [vmem:[#allocation2 + $0x18] sm:$0xff] %vm975_vm5, %v2470_v44  ;;  %1226 = vst.msk [vmem:[#allocation6 + $0x18] sm:$0xff] %vm975_vm5, %v2470_v44  ;;  %940 = vperm.xlu1 %1932, %v2470_v44   ;;  %v980_v44 = vld [vmem:[#allocation4] sm:$0xff] }
 0x1ff   : > { %986 = vperm.xlu1 %1932, %v2479_v46  }
 0x232   : > { %v926_v47 = vpop.permute.xlu0 %925 }
 0x233   : > { %v943_v48 = vsub.f32 %v2384_v21, %v926_v47  ;;  %v1028_v47 = vpack.c.bf16 %v864_v39, %v863_v38 }
 0x235   : > { %v947_v49 = vmul.f32 1.442695, %v943_v48  ;;  %v1037_v48 = vpack.c.bf16 %v882_v42, %v881_v40 }
 0x236   : > { %v931_v50 = vpop.permute.xlu1 %930 }
 0x237   : > { %1935 = vpow2.f32 %v947_v49  ;;  %v944_v51 = vsub.f32 %v2388_v24, %v931_v50  ;;  %v879_v49 = vld [vmem:[%s2226_s26 + $0x180] sm:$0xff]  ;;  %v880_v50 = vld [vmem:[%s2226_s26 + $0x188] sm:$0xff] }
 0x239   : > { %v949_v52 = vmul.f32 1.442695, %v944_v51  ;;  %v1036_v51 = vpack.c.bf16 %v880_v50, %v879_v49 }
 0x23b   : > { %1937 = vpow2.f32 %v949_v52 }
 0x23c   : > { %1939 = vpow2.f32 %v919_v56 }
 0x23d   : > { %1941 = vpow2.f32 %v917_v11 }
 0x244   : > { %v1936_v55 = vpop.eup %1935 }
 0x245   : > { %1218 = vst [vmem:[#allocation5 + $0x10] sm:$0xff] %v1936_v55  ;;  %963 = vadd.xlane.f32.xlu1 %v1936_v55  ;;  %v1008_v21 = vpack.c.bf16 %v1936_v55, %v1936_v55 }
 0x247   : > { %1783 = vmatmul.mubr.bf16.vlgmr.msra.gmra.mxu0 %v1008_v21 }
 0x248   : > { %v1938_v24 = vpop.eup %1937  ;;  %1807 = vmatpush3.bf16.msra.mxu0 %v1035_v57  ;;  %1822 = vmatprep.mubr.msk.bf16.mxu0 %vm2104_vm3, %v2103_v5 }
 0x249   : > { %1219 = vst [vmem:[#allocation5] sm:$0xff] %v1938_v24  ;;  %965 = vadd.xlane.f32.xlu0 %v1938_v24  ;;  %v1009_v2 = vpack.c.bf16 %v1938_v24, %v1938_v24  ;;  %1808 = vmatprep.subr.bf16.mxu0 %v2103_v5  ;;  %v2515_v23 = vpop.eup %1939  ;;  %v959_v24 = vmul.f32 %v2479_v46, %v955_v61  ;;  %v957_v46 = vld [vmem:[#allocation3 + $0x10] sm:$0xff] }
 0x24a   : > { %v1942_v43 = vpop.eup %1941  ;;  %v961_v9 = vmul.f32 %v2515_v23, %v957_v46 }
 0x24b   : > { %1803 = vmatmul.mubr.bf16.vlgmr.msra.gmra.mxu1 %v1009_v2 }
 0x24c   : > { %1809 = vmatpush3.bf16.msra.mxu0 %v1034_v62  ;;  %1827 = vmatpush3.bf16.msra.mxu1 %v1043_v63  ;;  %v956_v63 = vld [vmem:[#allocation3 + $0x8] sm:$0xff] }
 0x24d   : > { %1810 = vmatprep.subr.bf16.mxu0 %v2103_v5  ;;  %1828 = vmatprep.subr.bf16.mxu1 %v2103_v5  ;;  %v960_v2 = vmul.f32 %v1942_v43, %v956_v63 }
 0x24e   : > { %1842 = vmatprep.mubr.msk.bf16.mxu1 %vm2104_vm3, %v2103_v5 }
 0x250   : > { %1811 = vmatpush3.bf16.msra.mxu0 %v1033_v7  ;;  %1829 = vmatpush3.bf16.msra.mxu1 %v1042_v8 }
 0x251   : > { %1812 = vmatprep.subr.bf16.mxu0 %v2103_v5  ;;  %1830 = vmatprep.subr.bf16.mxu1 %v2103_v5 }
 0x254   : > { %1813 = vmatpush3.bf16.msra.mxu0 %v1032_v16  ;;  %1831 = vmatpush3.bf16.msra.mxu1 %v1041_v17 }
 0x255   : > { %1814 = vmatprep.subr.bf16.mxu0 %v2103_v5  ;;  %1832 = vmatprep.subr.bf16.mxu1 %v2103_v5 }
 0x256   : > { %996 = vperm.xlu1 %1932, %v2515_v23  }
 0x258   : > { %1815 = vmatpush3.bf16.msra.mxu0 %v1031_v19  ;;  %1833 = vmatpush3.bf16.msra.mxu1 %v1040_v20 }
 0x259   : > { %1816 = vmatprep.subr.bf16.mxu0 %v2103_v5  ;;  %1834 = vmatprep.subr.bf16.mxu1 %v2103_v5 }
 0x25c   : > { %1817 = vmatpush3.bf16.msra.mxu0 %v1030_v28  ;;  %1835 = vmatpush3.bf16.msra.mxu1 %v1039_v29  ;;  %v982_v28 = vld [vmem:[#allocation4 + $0x10] sm:$0xff] }
 0x25d   : > { %1818 = vmatprep.subr.bf16.mxu0 %v2103_v5  ;;  %1836 = vmatprep.subr.bf16.mxu1 %v2103_v5 }
 0x25f   : > { %991 = vperm.xlu0 %1931, %v1942_v43  }
 0x260   : > { %1819 = vmatpush3.bf16.msra.mxu0 %v1029_v36  ;;  %1837 = vmatpush3.bf16.msra.mxu1 %v1038_v37 }
 0x261   : > { %1820 = vmatprep.subr.bf16.mxu0 %v2103_v5  ;;  %1838 = vmatprep.subr.bf16.mxu1 %v2103_v5 }
 0x264   : > { %1821 = vmatpush3.bf16.msra.mxu0 %v1028_v47  ;;  %1839 = vmatpush3.bf16.msra.mxu1 %v1037_v48 }
 0x265   : > { %1840 = vmatprep.subr.bf16.mxu1 %v2103_v5  ;;  %v921_v5 = vmul.f32 1.442695, %v914_v45 }
 0x268   : > { %1841 = vmatpush3.bf16.msra.mxu1 %v1036_v51 }
 0x272   : > { %v936_v52 = vpop.permute.xlu1 %935 }
 0x273   : > { %v945_v53 = vsub.f32 %v2392_v32, %v936_v52 }
 0x275   : > { %v951_v54 = vmul.f32 1.442695, %v945_v53 }
 0x276   : > { %v941_v55 = vpop.permute.xlu1 %940 }
 0x277   : > { %1943 = vpow2.f32 %v951_v54  ;;  %v946_v56 = vsub.f32 %v2396_v35, %v941_v55 }
 0x279   : > { %v953_v57 = vmul.f32 1.442695, %v946_v56 }
 0x27a   : > { %v987_v35 = vpop.permute.xlu1 %986 }
 0x27b   : > { %1945 = vpow2.f32 %v953_v57  ;;  %v1004_v45 = vmul.f32 %v987_v35, %v980_v44 }
 0x27c   : > { %1947 = vpow2.f32 %v921_v5 }
 0x284   : > { %v1944_v58 = vpop.eup %1943 }
 0x285   : > { %1220 = vst [vmem:[#allocation5 + $0x18] sm:$0xff] %v1944_v58  ;;  %967 = vadd.xlane.f32.xlu1 %v1944_v58  ;;  %v1010_v21 = vpack.c.bf16 %v1944_v58, %v1944_v58 }
 0x287   : > { %1823 = vmatmul.mubr.bf16.vlgmr.msra.gmra.mxu0 %v1010_v21 }
 0x288   : > { %v1946_v59 = vpop.eup %1945 }
 0x289   : > { %1221 = vst [vmem:[#allocation5 + $0x8] sm:$0xff] %v1946_v59  ;;  %969 = vadd.xlane.f32.xlu1 %v1946_v59  ;;  %v1011_v32 = vpack.c.bf16 %v1946_v59, %v1946_v59  ;;  %v1948_v60 = vpop.eup %1947 }
 0x28a   : > { %v962_v25 = vmul.f32 %v1948_v60, %v958_v18 }
 0x28b   : > { %1843 = vmatmul.mubr.bf16.vlgmr.msra.gmra.mxu1 %v1011_v32 }
 0x29a   : > { %1001 = vperm.xlu1 %1932, %v1948_v60  }
 0x2ce   : > { %v964_v62 = vpop.xlane.xlu1 %963 }
 0x2cf   : > { %v971_v1 = vadd.f32 %v964_v62, %v959_v24 }
 0x2d1   : > { %976 = vst.msk [vmem:[#allocation3] sm:$0xff] %vm975_vm5, %v971_v1 }
 0x2d2   : > { %v966_v3 = vpop.xlane.xlu0 %965  ;;  %v997_v11 = vpop.permute.xlu1 %996 }
 0x2d3   : > { %v972_v41 = vadd.f32 %v966_v3, %v960_v2  ;;  %v1006_v29 = vmul.f32 %v997_v11, %v982_v28 }
 0x2d5   : > { %977 = vst.msk [vmem:[#allocation3 + $0x8] sm:$0xff] %vm975_vm5, %v972_v41 }
 0x2da   : > { %v992_v6 = vpop.permute.xlu0 %991 }
 0x2db   : > { %v1005_v12 = vmul.f32 %v992_v6, %v981_v4 }
 0x307   : > { %v1078_v7 = vpop.f32.mrf.mxu0 }
 0x308   : > { %v1204_v8 = vadd.f32 %v1078_v7, %v1004_v45 }
 0x309   : > { %v1784_v10 = vpop.f32.mrf.mxu0 }
 0x30a   : > { %1208 = vst.msk [vmem:[#allocation4] sm:$0xff] %vm552_vm2, %v1204_v8 }
 0x30b   : > { %v1081_v14 = vpop.f32.mrf.mxu0  ;;  %v1118_v15 = vpop.f32.mrf.mxu1 }
 0x30c   : > { %v1205_v16 = vadd.f32 %v1118_v15, %v1005_v12 }
 0x30d   : > { %v1785_v17 = vpop.f32.mrf.mxu0  ;;  %v1804_v0 = vpop.f32.mrf.mxu1 }
 0x30e   : > { %1209 = vst.msk [vmem:[#allocation4 + $0x8] sm:$0xff] %vm552_vm2, %v1205_v16  ;;  %v968_v13 = vpop.xlane.xlu1 %967 }
 0x30f   : > { %v973_v19 = vadd.f32 %v968_v13, %v961_v9  ;;  %v1121_v20 = vpop.f32.mrf.mxu1 }
 0x311   : > { %978 = vst.msk [vmem:[#allocation3 + $0x10] sm:$0xff] %vm975_vm5, %v973_v19  ;;  %v1805_v22 = vpop.f32.mrf.mxu1 }
 0x312   : > { %v970_v26 = vpop.xlane.xlu1 %969 }
 0x313   : > { %v974_v27 = vadd.f32 %v970_v26, %v962_v25 }
 0x315   : > { %979 = vst.msk [vmem:[#allocation3 + $0x18] sm:$0xff] %vm975_vm5, %v974_v27 }
 0x316   : > { %v1002_v31 = vpop.permute.xlu1 %1001 }
 0x317   : > { %v1007_v36 = vmul.f32 %v1002_v31, %v983_v30 }
 0x347   : > { %v1158_v33 = vpop.f32.mrf.mxu0 }
 0x348   : > { %v1206_v23 = vadd.f32 %v1158_v33, %v1006_v29 }
 0x349   : > { %v1824_v34 = vpop.f32.mrf.mxu0 }
 0x34a   : > { %1210 = vst.msk [vmem:[#allocation4 + $0x10] sm:$0xff] %vm552_vm2, %v1206_v23 }
 0x34b   : > { %v1161_v37 = vpop.f32.mrf.mxu0  ;;  %v1198_v38 = vpop.f32.mrf.mxu1 }
 0x34c   : > { %v1207_v39 = vadd.f32 %v1198_v38, %v1007_v36 }
 0x34d   : > { %v1825_v40 = vpop.f32.mrf.mxu0  ;;  %v1844_v42 = vpop.f32.mrf.mxu1 }
 0x34e   : > { %1211 = vst.msk [vmem:[#allocation4 + $0x18] sm:$0xff] %vm552_vm2, %v1207_v39 }
 0x34f   : > { %v1201_v43 = vpop.f32.mrf.mxu1 }
 0x351   : > { %v1845_v47 = vpop.f32.mrf.mxu1 }
 0x352 PF: > { %p1227_p1 = scmp.eq.s32.totalorder %s2083_s18, 1  ;;  %p1597_p2 = scmp.ne.s32.totalorder %s2083_s18, 1 }
 0x354   : > { %1230 = sbr.rel (%p1597_p2) target bundleno = 1012 (0x3f4), region = 44 }
 0x359   : > { %v1233_v48 = vld [vmem:[#allocation3 + $0x10] sm:$0xff]  ;;  %v2106_v51 = vmov 0   ;;  %v1231_v53 = vld [vmem:[#allocation3] sm:$0xff]  ;;  %v1234_v57 = vld [vmem:[#allocation3 + $0x18] sm:$0xff] }
 0x35a   : > { %v1247_v49 = vld [vmem:[#allocation6 + $0x10] sm:$0xff]  ;;  %1950 = vset.pattern.permute.xlu1 %v2106_v51  ;;  %1949 = vset.pattern.permute.xlu0 %v2106_v51  ;;  %1951 = vrcp.f32 %v1233_v48  ;;  %v1245_v54 = vld [vmem:[#allocation6] sm:$0xff]  ;;  %v1248_v58 = vld [vmem:[#allocation6 + $0x18] sm:$0xff] }
 0x35b   : > { %v1251_v50 = vld [vmem:[#allocation2 + $0x10] sm:$0xff]  ;;  %v1249_v55 = vld [vmem:[#allocation2] sm:$0xff]  ;;  %1953 = vrcp.f32 %v1231_v53  ;;  %v1252_v21 = vld [vmem:[#allocation2 + $0x18] sm:$0xff] }
 0x35c   : > { %v1255_v52 = vsub.f32 %v1247_v49, %v1251_v50  ;;  %v1253_v56 = vsub.f32 %v1245_v54, %v1249_v55  ;;  %1955 = vrcp.f32 %v1234_v57  ;;  %v1256_v5 = vsub.f32 %v1248_v58, %v1252_v21  ;;  %v1232_v32 = vld [vmem:[#allocation3 + $0x8] sm:$0xff]  ;;  %v1272_v12 = vld [vmem:[#allocation5 + $0x18] sm:$0xff]  ;;  %v1270_v46 = vld [vmem:[#allocation5 + $0x10] sm:$0xff] }
 0x35d   : > { %v1246_v60 = vld [vmem:[#allocation6 + $0x8] sm:$0xff]  ;;  %1957 = vrcp.f32 %v1232_v32  ;;  %v1271_v9 = vld [vmem:[#allocation5] sm:$0xff] }
 0x35e   : > { %v1261_v59 = vmul.f32 1.442695, %v1255_v52  ;;  %v1250_v35 = vld [vmem:[#allocation2 + $0x8] sm:$0xff]  ;;  %v1257_v61 = vmul.f32 1.442695, %v1253_v56 }
 0x35f   : > { %v1254_v24 = vsub.f32 %v1246_v60, %v1250_v35  ;;  %v1263_v62 = vmul.f32 1.442695, %v1256_v5  ;;  %v1273_v0 = vld [vmem:[#allocation5 + $0x8] sm:$0xff] }
 0x360   : > { %1959 = vpow2.f32 %v1261_v59 }
 0x361   : > { %1961 = vpow2.f32 %v1257_v61  ;;  %v1259_v63 = vmul.f32 1.442695, %v1254_v24 }
 0x362   : > { %1963 = vpow2.f32 %v1263_v62 }
 0x363   : > { %1965 = vpow2.f32 %v1259_v63 }
 0x367   : > { %v1952_v1 = vpop.eup %1951 }
 0x368   : > { %v1954_v2 = vpop.eup %1953 }
 0x369   : > { %v1956_v3 = vpop.eup %1955 }
 0x36a   : > { %v1958_v41 = vpop.eup %1957 }
 0x36d   : > { %v1960_v44 = vpop.eup %1959 }
 0x36e   : > { %v1962_v45 = vpop.eup %1961  ;;  %v1267_v4 = vmul.f32 %v1960_v44, %v1952_v1 }
 0x36f   : > { %v1964_v6 = vpop.eup %1963  ;;  %v1265_v7 = vmul.f32 %v1962_v45, %v1954_v2 }
 0x370   : > { %v1966_v8 = vpop.eup %1965  ;;  %1286 = vperm.xlu1 %1950, %v1267_v4   ;;  %v1268_v10 = vmul.f32 %v1964_v6, %v1956_v3 }
 0x371   : > { %1276 = vperm.xlu0 %1949, %v1265_v7   ;;  %v1266_v11 = vmul.f32 %v1966_v8, %v1958_v41 }
 0x374   : > { %1291 = vperm.xlu1 %1950, %v1268_v10  }
 0x375   : > { %1281 = vperm.xlu0 %1949, %v1266_v11  }
 0x3eb   : > { %v1287_v14 = vpop.permute.xlu1 %1286 }
 0x3ec   : > { %v1296_v15 = vmul.f32 %v1287_v14, %v1272_v12  ;;  %v1277_v16 = vpop.permute.xlu0 %1276 }
 0x3ed   : > { %v1294_v17 = vmul.f32 %v1277_v16, %v1270_v46 }
 0x3ee   : > { %1300 = vst [vmem:[%s2230_s21 + $0x10] sm:$0xff] %v1296_v15 }
 0x3ef   : > { %1298 = vst [vmem:[%s2230_s21] sm:$0xff] %v1294_v17  ;;  %v1292_v13 = vpop.permute.xlu1 %1291 }
 0x3f0   : > { %v1297_v18 = vmul.f32 %v1292_v13, %v1273_v0  ;;  %v1282_v19 = vpop.permute.xlu0 %1281 }
 0x3f1   : > { %v1295_v20 = vmul.f32 %v1282_v19, %v1271_v9 }
 0x3f2   : > { %1301 = vst [vmem:[%s2230_s21 + $0x18] sm:$0xff] %v1297_v18 }
 0x3f3   : > { %1299 = vst [vmem:[%s2230_s21 + $0x8] sm:$0xff] %v1295_v20 }
 0x3f4 PF: > { %1305 = sbr.rel (!%p1227_p1) target bundleno = 1159 (0x487), region = 48  ;;  %v1308_v22 = vld [vmem:[#allocation3 + $0x10] sm:$0xff] (%p1227_p1)  ;;  %v1306_v25 = vld [vmem:[#allocation3] sm:$0xff] (%p1227_p1)  ;;  %v1309_v26 = vld [vmem:[#allocation3 + $0x18] sm:$0xff] (%p1227_p1)  ;;  %v2107_v27 = vmov (%p1227_p1), 0   ;;  %vm1342_vm6 = vcmask (%p1227_p1), 261120  }
 0x3f5   : > { %1968 = vset.pattern.permute.xlu1 (%p1227_p1), %v2107_v27  ;;  %1967 = vset.pattern.permute.xlu0 (%p1227_p1), %v2107_v27  ;;  %1969 = vrcp.f32 (%p1227_p1), %v1308_v22  ;;  %v1307_v28 = vld [vmem:[#allocation3 + $0x8] sm:$0xff] (%p1227_p1)  ;;  %v1316_v23 = vld [vmem:[#allocation4 + $0x10] sm:$0xff] (%p1227_p1)  ;;  %v1314_v34 = vld [vmem:[#allocation4] sm:$0xff] (%p1227_p1) }
 0x3f6   : > { %1971 = vrcp.f32 (%p1227_p1), %v1306_v25  ;;  %v1317_v40 = vld [vmem:[#allocation4 + $0x18] sm:$0xff] (%p1227_p1)  ;;  %v1315_v42 = vld [vmem:[#allocation4 + $0x8] sm:$0xff] (%p1227_p1) }
 0x3f7   : > { %1973 = vrcp.f32 (%p1227_p1), %v1309_v26 }
 0x3f8   : > { %1975 = vrcp.f32 (%p1227_p1), %v1307_v28 }
 0x402   : > { %v1970_v29 = vpop.eup %1969 }
 0x403   : > { %v1972_v30 = vpop.eup %1971  ;;  %1330 = vperm.xlu1 %1968, %v1970_v29  }
 0x404   : > { %v1974_v31 = vpop.eup %1973  ;;  %1320 = vperm.xlu0 %1967, %v1972_v30  }
 0x405   : > { %v1976_v33 = vpop.eup %1975 }
 0x407   : > { %1335 = vperm.xlu1 %1968, %v1974_v31  }
 0x408   : > { %1325 = vperm.xlu0 %1967, %v1976_v33  }
 0x47e   : > { %v1331_v36 = vpop.permute.xlu1 %1330 }
 0x47f   : > { %v1340_v37 = vmul.f32 %v1331_v36, %v1316_v23  ;;  %v1321_v38 = vpop.permute.xlu0 %1320 }
 0x480   : > { %v1338_v39 = vmul.f32 %v1321_v38, %v1314_v34 }
 0x481   : > { %1345 = vst.msk [vmem:[%s2228_s25 + $0x10] sm:$0xff] %vm1342_vm6, %v1340_v37 }
 0x482   : > { %1343 = vst.msk [vmem:[%s2228_s25] sm:$0xff] %vm1342_vm6, %v1338_v39  ;;  %v1336_v43 = vpop.permute.xlu1 %1335 }
 0x483   : > { %v1341_v47 = vmul.f32 %v1336_v43, %v1317_v40  ;;  %v1326_v48 = vpop.permute.xlu0 %1325 }
 0x484   : > { %v1339_v49 = vmul.f32 %v1326_v48, %v1315_v42 }
 0x485   : > { %1346 = vst.msk [vmem:[%s2228_s25 + $0x18] sm:$0xff] %vm1342_vm6, %v1341_v47 }
 0x486   : > { %1344 = vst.msk [vmem:[%s2228_s25 + $0x8] sm:$0xff] %vm1342_vm6, %v1339_v49 }
 0x487 PF: > { %s1612_s18 = sshll.u32 %s2087_s19, 9  ;;  %s1369_s9 = sshll.u32 %s2228_s25, 4  ;;  %s2576_s9 = int_to_ptr.vmem [resolvable:$true] %s1369_s9 }
 0x488   : > { %s2573_s8 = scalar_lea.hbm %s2669_s3, %s1612_s18  ;;  %s1348_s10 = scalar_lea.sflag [#allocation8], %s2207_s6 }
 0x489   : > { %s1977_s11 = scalar_lea.vmem %s2576_s9, 512  ;;  %s2108_s12 = smov [#allocation7]  }
 0x48a   : > { %p1978_p4 = scmp.ne.s32.totalorder %s2576_s9, %s1977_s11  ;;  %s1981_s13 = sshll.u32 %s2108_s12, 4  ;;  %s1982_s13 = int_to_ptr.vmem [resolvable:$false] %s1981_s13 }
 0x48b   : > { %s1983_s14 = scalar_lea.vmem %s1982_s13, 1024  ;;  %p1984_p7 = scmp.lt.s32.totalorder %s2576_s9, %s1982_s13 }
 0x48c   : > { %p1979_p5 = pnand %p1978_p4, %p2186_p3  ;;  %p1985_p8 = scmp.lt.s32.totalorder %s1983_s14, %s1977_s11 }
 0x48e   : > { %p1980_p6 = pneg %p1979_p5  ;;  %p1986_p10 = por %p1985_p8, %p1984_p7 }
 0x490   : > { %p1987_p11 = pnand %p1986_p10, %p1980_p6 }
 0x492   : > { %1990 = shalt.err (!%p1987_p11)
}
 0x493   : > { %s1991_s25 = scalar_lea.hbm %s2573_s8, 512  ;;  %s1995_s29 = scalar_lea.hbm %s2669_s3, 1024 }
 0x494   : > { %p1992_p12 = scmp.ne.s32.totalorder %s2573_s8, %s1991_s25  ;;  %p1996_p1 = scmp.lt.s32.totalorder %s2573_s8, %s2669_s3 }
 0x495   : > { %p1997_p2 = scmp.lt.s32.totalorder %s1995_s29, %s1991_s25 }
 0x496   : > { %p1993_p13 = pnand %p1992_p12, %p2186_p3 }
 0x497   : > { %p1998_p4 = por %p1997_p2, %p1996_p1 }
 0x498   : > { %p1994_p0 = pneg %p1993_p13 }
 0x49a   : > { %p1999_p5 = pnand %p1998_p4, %p1994_p0 }
 0x49c   : > { %2002 = shalt.err (!%p1999_p5)
}
 0x49d   : > { %s2109_s7 = smov 128   ;;  %s2110_s11 = smov 8  }
 0x49e   : > { %1846 = dma.vmem_to_hbm [thread:$0]  (%p2186_p3), %s2576_s9, 512, %s2573_s8, %s1348_s10, %s2109_s7, %s2109_s7, %s2110_s11  }
 0x49f   : > { %s2609_s14 = scalar_lea.hbm %s2670_s4, %s1612_s18  ;;  %s1390_s25 = sshll.u32 %s2230_s21, 4  ;;  %s2612_s25 = int_to_ptr.vmem [resolvable:$true] %s1390_s25 }
 0x4a0   : > { %s1353_s23 = scalar_lea.sflag [#allocation10], %s2207_s6  ;;  %s2003_s24 = scalar_lea.vmem %s2612_s25, 512 }
 0x4a1   : > { %p2004_p6 = scmp.ne.s32.totalorder %s2612_s25, %s2003_s24  ;;  %s2111_s29 = smov [#allocation9]  }
 0x4a2   : > { %s2007_s8 = sshll.u32 %s2111_s29, 4  ;;  %s2008_s8 = int_to_ptr.vmem [resolvable:$false] %s2007_s8 }
 0x4a3   : > { %p2005_p7 = pnand %p2004_p6, %p2186_p3  ;;  %s2009_s19 = scalar_lea.vmem %s2008_s8, 1024 }
 0x4a4   : > { %p2010_p10 = scmp.lt.s32.totalorder %s2612_s25, %s2008_s8  ;;  %p2011_p11 = scmp.lt.s32.totalorder %s2009_s19, %s2003_s24 }
 0x4a5   : > { %p2006_p8 = pneg %p2005_p7 }
 0x4a6   : > { %p2012_p12 = por %p2011_p11, %p2010_p10 }
 0x4a8   : > { %p2013_p13 = pnand %p2012_p12, %p2006_p8 }
 0x4aa   : > { %2016 = shalt.err (!%p2013_p13)
}
 0x4ab   : > { %s2017_s21 = scalar_lea.hbm %s2609_s14, 512  ;;  %s2021_s9 = scalar_lea.hbm %s2670_s4, 1024 }
 0x4ac   : > { %p2018_p0 = scmp.ne.s32.totalorder %s2609_s14, %s2017_s21  ;;  %p2022_p4 = scmp.lt.s32.totalorder %s2609_s14, %s2670_s4 }
 0x4ad   : > { %p2023_p5 = scmp.lt.s32.totalorder %s2021_s9, %s2017_s21 }
 0x4ae   : > { %p2019_p1 = pnand %p2018_p0, %p2186_p3 }
 0x4af   : > { %p2024_p6 = por %p2023_p5, %p2022_p4 }
 0x4b0   : > { %p2020_p2 = pneg %p2019_p1 }
 0x4b2   : > { %p2025_p7 = pnand %p2024_p6, %p2020_p2 }
 0x4b4   : > { %2028 = shalt.err (!%p2025_p7)
}
 0x4b5   : > { %1847 = dma.vmem_to_hbm [thread:$0]  (%p2186_p3), %s2612_s25, 512, %s2609_s14, %s1353_s23, %s2109_s7, %s2109_s7, %s2110_s11  }
 0x4b6 PF: > { %p1857_p8 = scmp.ge.s32.totalorder %s2099_s22, 2  ;;  %s1405_s26 = sand.u32 1, %s2071_s15  }
 0x4b7   : > { %s1406_s12 = scalar_lea.sflag [#allocation8], %s1405_s26 }
 0x4b8   : > { %p1851_p10 = pnand %p1857_p8, %p2196_p9 }
 0x4ba   : > { %p1852_p11 = pneg %p1851_p10 }
 0x4bc   : > { %2062 = dma.done.wait (%p1852_p11), %s1406_s12, 512  }
 0x4bd   : > { %2064 = vsyncadd (%p1852_p11), %s1406_s12, 4294966784  ;;  %s1415_s13 = scalar_lea.sflag [#allocation10], %s1405_s26 }
 0x4be   : > { %2066 = dma.done.wait (%p1852_p11), %s1415_s13, 512  }
 0x4bf   : > { %2068 = vsyncadd (%p1852_p11), %s1415_s13, 4294966784  ;;  %s21_s22 = sadd.s32 1, %s2099_s22   ;;  %s2678_s19 = sld [smem:[#allocation13_spill]] }
 0x4c0   : > { %p18_p12 = scmp.ge.s32.totalorder %s21_s22, 6   ;;  %s2679_s27 = sld [smem:[#allocation14_spill]] }
 0x4c1   : > { %s2680_s21 = sld [smem:[#allocation15_spill]]  ;;  %s2681_s15 = smov %s2075_s16 }
 0x4c2   : > { %s2682_s16 = smov %s2079_s17  ;;  %s2683_s17 = smov %s2204_s5 }
 0x4c3   : > { %s2684_s18 = smov %s2091_s20  ;;  %20 = sbr.rel (!%p18_p12) target bundleno = 7 (0x7), region = 110 }
 0x4c6   : > { %s2685_s20 = smov %s2679_s27 }
 0x4c8   :  { %1420 = vsyncpa [#allocation8], 1 }
 0x4c9   :  { %1422 = vsyncpa [#allocation8 + $0x1], 1 }
 0x4ca   :  { %1423 = vsyncpa [#allocation10], 1 }
 0x4cb   :  { %1425 = vsyncpa [#allocation10 + $0x1], 1 }

</bundles_post_ra>
